<compile_context>
chip_gen: v5e
topology: v5e:2x2
jax: 0.10.0
libtpu: 0.0.40
codegen_flags: <defaults>
</compile_context>

<pallas_src>
import math
from functools import partial

import jax
import jax.numpy as jnp
from jax import lax
from jax.experimental import pallas as pl
from jax.experimental.pallas import tpu as pltpu

LN_EPS = 1e-5  # torch.nn.LayerNorm default


# ----------------------------- in-kernel helpers -----------------------------

def _layernorm(x, g, b):
    """LayerNorm over last axis, computed in float32 (matches CLIP LayerNorm)."""
    xf = x.astype(jnp.float32)
    mu = jnp.mean(xf, axis=-1, keepdims=True)
    var = jnp.mean((xf - mu) ** 2, axis=-1, keepdims=True)
    return (xf - mu) * lax.rsqrt(var + LN_EPS) * g + b


# --------------------------------- kernels -----------------------------------

def patch_embed_kernel(p_ref, w_ref, o_ref):
    # p block: (mb, 3*ps*ps) bf16, w: (3*ps*ps, D) bf16  -> conv1 as matmul
    o_ref[...] = jnp.dot(p_ref[...], w_ref[...],
                         preferred_element_type=jnp.float32).astype(o_ref.dtype)


def pre_ln_kernel(x_ref, pos_ref, g_ref, b_ref, o_ref):
    # x block: (1, S, D) bf16, pos: (S, D) f32, g/b: (1, D) f32
    x = x_ref[0].astype(jnp.float32) + pos_ref[...].astype(jnp.float32)
    o_ref[...] = _layernorm(x, g_ref[...], b_ref[...])[None, :, :].astype(o_ref.dtype)


def resblock_kernel(x_ref,
                    ln1_g, ln1_b,
                    wqkv, bqkv, wo3, bo,
                    ln2_g, ln2_b,
                    wfc, bfc, wpr, bpr,
                    o_ref, *, n_head):
    # x block: (1, S, D) bf16  (grid iterates over batch, weights are resident)
    x = x_ref[0].astype(jnp.float32)                  # (S, D) f32
    S, D = x.shape
    Dh = D // n_head

    # ---- self-attention branch (pre-LN) ----
    h = _layernorm(x, ln1_g[...], ln1_b[...])         # f32
    # Fused QKV projection: one bf16 MXU pass (1/sqrt(Dh) already folded into Q cols).
    qkv = jnp.dot(h.astype(jnp.bfloat16), wqkv[...],
                  preferred_element_type=jnp.float32) + bqkv[...]    # (S, 3D) f32

    def split_heads(mat):  # (S, D) f32 -> (H, S, Dh) bf16
        parts = [mat[:, i * Dh:(i + 1) * Dh] for i in range(n_head)]
        return jnp.stack(parts, axis=0).astype(jnp.bfloat16)

    qh = split_heads(qkv[:, :D])
    kh = split_heads(qkv[:, D:2 * D])
    vh = split_heads(qkv[:, 2 * D:])

    # Batched per-head attention (one batched dot_general per stage).
    s = jnp.einsum('hqd,hkd->hqk', qh, kh,
                   preferred_element_type=jnp.float32)               # (H, S, S) f32
    s = s - jnp.max(s, axis=-1, keepdims=True)
    p = jnp.exp(s)
    p = p * pl.reciprocal(jnp.sum(p, axis=-1, keepdims=True), approx=True)
    ctx = jnp.einsum('hqk,hkd->hqd', p.astype(jnp.bfloat16), vh,
                     preferred_element_type=jnp.float32)             # (H, S, Dh) f32

    # Per-head output projection summed over heads (avoids a narrow-lane concat;
    # writes stay lane-dense in D).
    o_heads = jnp.einsum('hqd,hdm->hqm', ctx.astype(jnp.bfloat16), wo3[...],
                         preferred_element_type=jnp.float32)         # (H, S, D) f32
    x = x + jnp.sum(o_heads, axis=0) + bo[...]

    # ---- MLP branch (QuickGELU) ----
    h2 = _layernorm(x, ln2_g[...], ln2_b[...])
    f = jnp.dot(h2.astype(jnp.bfloat16), wfc[...],
                preferred_element_type=jnp.float32) + bfc[...]
    f = f * jax.nn.sigmoid(1.702 * f)
    m = jnp.dot(f.astype(jnp.bfloat16), wpr[...],
                preferred_element_type=jnp.float32) + bpr[...]
    x = x + m

    o_ref[...] = x[None, :, :].astype(o_ref.dtype)


def post_proj_kernel(x_ref, g_ref, b_ref, proj_ref, o_ref):
    # x: (B*T, D) bf16, proj: (D, output_dim) bf16 -> f32 output
    h = _layernorm(x_ref[...], g_ref[...], b_ref[...])
    o_ref[...] = jnp.dot(h.astype(jnp.bfloat16), proj_ref[...],
                         preferred_element_type=jnp.float32).astype(o_ref.dtype)


# ------------------------------ pallas wrappers -------------------------------

_VMEM = pl.BlockSpec(memory_space=pltpu.MemorySpace.VMEM)


def _patch_embed_call(patches, wc):
    """patches: (M, K) bf16, wc: (K, D) bf16 -> (M, D) bf16, row-tiled grid."""
    M, K = patches.shape
    D = wc.shape[1]
    mb = M
    for cand in (512, 256, 128):          # pick a divisor so no partial blocks
        if M % cand == 0:
            mb = cand
            break
    grid = (M // mb,)
    return pl.pallas_call(
        patch_embed_kernel,
        grid=grid,
        out_shape=jax.ShapeDtypeStruct((M, D), jnp.bfloat16),
        in_specs=[pl.BlockSpec((mb, K), lambda i: (i, 0)),
                  pl.BlockSpec((K, D), lambda i: (0, 0))],
        out_specs=pl.BlockSpec((mb, D), lambda i: (i, 0)),
        compiler_params=pltpu.CompilerParams(
            dimension_semantics=("parallel",)),
    )(patches, wc)


def _pre_ln_call(xtok, pos, g, b):
    B, S, D = xtok.shape
    return pl.pallas_call(
        pre_ln_kernel,
        grid=(B,),
        out_shape=jax.ShapeDtypeStruct((B, S, D), jnp.bfloat16),
        in_specs=[pl.BlockSpec((1, S, D), lambda i: (i, 0, 0)),
                  pl.BlockSpec((S, D), lambda i: (0, 0)),
                  pl.BlockSpec((1, D), lambda i: (0, 0)),
                  pl.BlockSpec((1, D), lambda i: (0, 0))],
        out_specs=pl.BlockSpec((1, S, D), lambda i: (i, 0, 0)),
        compiler_params=pltpu.CompilerParams(
            dimension_semantics=("parallel",)),
    )(xtok, pos, g, b)


def _resblock_call(x, blk, n_head):
    B, S, D = x.shape
    H = n_head
    Dh = D // H

    def rep(shape):
        return pl.BlockSpec(shape, lambda b: (0,) * len(shape))

    in_specs = [
        pl.BlockSpec((1, S, D), lambda b: (b, 0, 0)),      # x
        rep((1, D)), rep((1, D)),                          # ln1 g, b
        rep((D, 3 * D)), rep((1, 3 * D)),                  # wqkv, bqkv (fused)
        rep((H, Dh, D)), rep((1, D)),                      # wo3 (per-head), bo
        rep((1, D)), rep((1, D)),                          # ln2 g, b
        rep((D, 4 * D)), rep((1, 4 * D)),                  # wfc, bfc
        rep((4 * D, D)), rep((1, D)),                      # wpr, bpr
    ]
    out_specs = pl.BlockSpec((1, S, D), lambda b: (b, 0, 0))

    # Explicit VMEM budget: bf16 weights (pipeline double-buffers them) + bf16
    # activation blocks + f32 intermediates, with margin; floored at 32 MiB.
    weight_bytes = (D * 3 * D + H * Dh * D + D * 4 * D + 4 * D * D) * 2      # bf16
    act_bytes = (S * D * 2) * 4                                              # x/out blocks
    interm_bytes = (S * 3 * D + H * S * S + 3 * H * S * Dh + H * S * D + S * 4 * D) * 4
    est = 2 * weight_bytes + 2 * act_bytes + 2 * interm_bytes + (4 << 20)
    vmem_limit = int(min(100 * (1 << 20), max(32 * (1 << 20), est)))

    return pl.pallas_call(
        partial(resblock_kernel, n_head=n_head),
        grid=(B,),
        out_shape=jax.ShapeDtypeStruct((B, S, D), jnp.bfloat16),
        in_specs=in_specs,
        out_specs=out_specs,
        compiler_params=pltpu.CompilerParams(
            dimension_semantics=("parallel",),
            vmem_limit_bytes=vmem_limit),
    )(x,
      blk["ln1_g"], blk["ln1_b"],
      blk["wqkv"], blk["bqkv"], blk["wo3"], blk["bo"],
      blk["ln2_g"], blk["ln2_b"],
      blk["wfc"], blk["bfc"], blk["wpr"], blk["bpr"])


# --------------------------------- forward ------------------------------------

def vision_transformer_forward(params, x, cfg):
    """x: (B, 3, R, R) float32 (NCHW). Returns (B, extra_token, output_dim) f32."""
    B = x.shape[0]
    ps = cfg["patch_size"]
    D = cfg["width"]
    R = cfg["input_resolution"]
    G = R // ps
    N = G * G
    T = cfg["extra_token"]
    S = N + T
    O = cfg["output_dim"]
    H = cfg["heads"]

    # --- conv1 (stride==kernel, no bias) as patch extraction + matmul kernel ---
    patches = x.reshape(B, 3, G, ps, G, ps).transpose(0, 2, 4, 1, 3, 5)
    patches = patches.reshape(B * N, 3 * ps * ps).astype(jnp.bfloat16)
    tok = _patch_embed_call(patches, params["conv_w"])        # (B*N, D) bf16
    tok = tok.reshape(B, N, D)

    # --- class token concat (glue), then +pos and ln_pre (per-batch kernel) ---
    cls = jnp.broadcast_to(params["class_embedding"].astype(jnp.bfloat16)[None],
                           (B, T, D))
    xtok = jnp.concatenate([cls, tok], axis=1)                # (B, S, D) bf16
    h = _pre_ln_call(xtok, params["positional_embedding"],
                     params["ln_pre_g"], params["ln_pre_b"])  # (B, S, D) bf16

    # --- transformer (residual attention blocks) ---
    for blk in params["blocks"]:
        h = _resblock_call(h, blk, H)

    # --- ln_post on CLS token(s) + projection ---
    cls_out = h[:, :T, :].reshape(B * T, D)
    out = pl.pallas_call(
        post_proj_kernel,
        out_shape=jax.ShapeDtypeStruct((B * T, O), jnp.float32),
        in_specs=[_VMEM] * 4,
        out_specs=_VMEM,
    )(cls_out, params["ln_post_g"], params["ln_post_b"], params["proj"])
    return out.reshape(B, T, O)


# ----------------------------- parameter init ---------------------------------

def init_params(key, *, input_resolution, patch_size, width, layers, heads,
                output_dim, extra_token):
    D = width
    G = input_resolution // patch_size
    S = G * G + extra_token
    Dh = D // heads
    scale = D ** (-0.5)
    proj_std = D ** (-0.5) * (2 * layers) ** (-0.5)
    attn_std = D ** (-0.5)
    fc_std = (2 * D) ** (-0.5)

    keys = iter(jax.random.split(key, 8 + 8 * layers))

    def nrm(shape, std):
        return std * jax.random.normal(next(keys), shape, jnp.float32)

    conv_w = nrm((D, 3, patch_size, patch_size),
                 (3 * patch_size * patch_size) ** (-0.5))
    params = {
        # stored as (3*ps*ps, D) for patches @ W, bf16 for MXU
        "conv_w": conv_w.reshape(D, 3 * patch_size * patch_size).T.astype(jnp.bfloat16),
        "class_embedding": nrm((extra_token, D), scale),
        "positional_embedding": nrm((S, D), scale),
        "ln_pre_g": jnp.ones((1, D), jnp.float32),
        "ln_pre_b": jnp.zeros((1, D), jnp.float32),
        "ln_post_g": jnp.ones((1, D), jnp.float32),
        "ln_post_b": jnp.zeros((1, D), jnp.float32),
        "proj": nrm((D, output_dim), scale).astype(jnp.bfloat16),
        "blocks": [],
    }

    qk_scale = Dh ** (-0.5)
    for _ in range(layers):
        # PyTorch-shaped weights (out, in); transposed to (in, out) for x @ W.
        in_proj_w = nrm((3 * D, D), attn_std)     # nn.MultiheadAttention.in_proj_weight
        out_proj_w = nrm((D, D), proj_std)
        c_fc_w = nrm((4 * D, D), fc_std)
        c_proj_w = nrm((D, 4 * D), proj_std)

        wq = in_proj_w[:D].T * qk_scale           # fold 1/sqrt(Dh) into Q columns
        wk = in_proj_w[D:2 * D].T
        wv = in_proj_w[2 * D:].T
        wqkv = jnp.concatenate([wq, wk, wv], axis=1)          # (D, 3D)
        wo3 = out_proj_w.T.reshape(heads, Dh, D)              # (H, Dh, D)

        blk = {
            "ln1_g": jnp.ones((1, D), jnp.float32),
            "ln1_b": jnp.zeros((1, D), jnp.float32),
            "wqkv": wqkv.astype(jnp.bfloat16),
            "bqkv": jnp.zeros((1, 3 * D), jnp.float32),       # (bq*scale, bk, bv) = 0
            "wo3": wo3.astype(jnp.bfloat16),
            "bo": jnp.zeros((1, D), jnp.float32),
            "ln2_g": jnp.ones((1, D), jnp.float32),
            "ln2_b": jnp.zeros((1, D), jnp.float32),
            "wfc": c_fc_w.T.astype(jnp.bfloat16),
            "bfc": jnp.zeros((1, 4 * D), jnp.float32),
            "wpr": c_proj_w.T.astype(jnp.bfloat16),
            "bpr": jnp.zeros((1, D), jnp.float32),
        }
        params["blocks"].append(blk)
    return params


# ----------------------------------- main --------------------------------------

if __name__ == "__main__":
    cfg = dict(input_resolution=16, patch_size=4, width=32, layers=2, heads=4,
               output_dim=16, extra_token=1)

    key = jax.random.PRNGKey(0)
    pkey, xkey = jax.random.split(key)
    params = init_params(pkey, **cfg)

    x = jax.random.normal(
        xkey, (2, 3, cfg["input_resolution"], cfg["input_resolution"]), jnp.float32)

    fwd = jax.jit(partial(vision_transformer_forward, cfg=cfg))
    out = fwd(params, x)
    out = jax.block_until_ready(out)
    assert out.shape == (2, cfg["extra_token"], cfg["output_dim"])
    assert bool(jnp.all(jnp.isfinite(out)))
    print("KERNEL_OK")
</pallas_src>

<mosaic_0001>
module attributes {stable_mosaic.version = 11 : i64} {
  func.func @patch_embed_kernel(%arg0: i32, %arg1: memref<32x48xbf16, #tpu.memory_space<vmem>>, %arg2: memref<48x32xbf16, #tpu.memory_space<vmem>>, %arg3: memref<32x32xbf16, #tpu.memory_space<vmem>>) attributes {dimension_semantics = [#tpu.dimension_semantics<parallel>], iteration_bounds = array<i64: 1>, scalar_prefetch = 0 : i64, scratch_operands = 0 : i64, tpu.core_type = #tpu.core_type<tc>, window_params = [{transform_indices = @transform_0, window_bounds = array<i64: 32, 48>}, {pipeline_mode = #tpu.pipeline_mode<synchronous>, transform_indices = @transform_1, window_bounds = array<i64: 48, 32>}, {transform_indices = @transform_2, window_bounds = array<i64: 32, 32>}]} {
    %c0 = arith.constant 0 : index
    %c0_0 = arith.constant 0 : index
    %0 = vector.load %arg1[%c0, %c0_0] : memref<32x48xbf16, #tpu.memory_space<vmem>>, vector<32x48xbf16>
    %c0_1 = arith.constant 0 : index
    %c0_2 = arith.constant 0 : index
    %1 = vector.load %arg2[%c0_1, %c0_2] : memref<48x32xbf16, #tpu.memory_space<vmem>>, vector<48x32xbf16>
    %cst = arith.constant dense<0.000000e+00> : vector<32x32xf32>
    %2 = tpu.matmul %0, %1, %cst {dimension_numbers = #tpu.dot_dimension_numbers<[1], [0], [0], [1], [0, 0, 1, 1], [], []>} : vector<32x48xbf16>, vector<48x32xbf16>, vector<32x32xf32> -> vector<32x32xf32>
    %3 = arith.truncf %2 : vector<32x32xf32> to vector<32x32xbf16>
    %c0_3 = arith.constant 0 : index
    %c0_4 = arith.constant 0 : index
    %4 = vector.load %arg3[%c0_3, %c0_4] : memref<32x32xbf16, #tpu.memory_space<vmem>>, vector<32x32xbf16>
    tpu.vector_store %arg3[%c0_3, %c0_4], %3 {strides = array<i32>} : memref<32x32xbf16, #tpu.memory_space<vmem>>, vector<32x32xbf16>,
    return
  }
  func.func @transform_0(%arg0: i32) -> (i32, i32) {
    %c0_i32 = arith.constant 0 : i32
    %c0_i32_0 = arith.constant 0 : i32
    return %arg0, %c0_i32 : i32, i32
  }
  func.func @transform_1(%arg0: i32) -> (i32, i32) {
    %c0_i32 = arith.constant 0 : i32
    %c0_i32_0 = arith.constant 0 : i32
    %c0_i32_1 = arith.constant 0 : i32
    return %c0_i32, %c0_i32_0 : i32, i32
  }
  func.func @transform_2(%arg0: i32) -> (i32, i32) {
    %c0_i32 = arith.constant 0 : i32
    %c0_i32_0 = arith.constant 0 : i32
    return %arg0, %c0_i32 : i32, i32
  }
}

module attributes {stable_mosaic.version = 11 : i64} {
  func.func @pre_ln_kernel(%arg0: i32, %arg1: memref<1x17x32xbf16, #tpu.memory_space<vmem>>, %arg2: memref<17x32xf32, #tpu.memory_space<vmem>>, %arg3: memref<1x32xf32, #tpu.memory_space<vmem>>, %arg4: memref<1x32xf32, #tpu.memory_space<vmem>>, %arg5: memref<1x17x32xbf16, #tpu.memory_space<vmem>>) attributes {dimension_semantics = [#tpu.dimension_semantics<parallel>], iteration_bounds = array<i64: 2>, scalar_prefetch = 0 : i64, scratch_operands = 0 : i64, tpu.core_type = #tpu.core_type<tc>, window_params = [{transform_indices = @transform_0, window_bounds = array<i64: 1, 17, 32>}, {pipeline_mode = #tpu.pipeline_mode<synchronous>, transform_indices = @transform_1, window_bounds = array<i64: 17, 32>}, {pipeline_mode = #tpu.pipeline_mode<synchronous>, transform_indices = @transform_2, window_bounds = array<i64: 1, 32>}, {pipeline_mode = #tpu.pipeline_mode<synchronous>, transform_indices = @transform_3, window_bounds = array<i64: 1, 32>}, {transform_indices = @transform_4, window_bounds = array<i64: 1, 17, 32>}]} {
    %c0 = arith.constant 0 : index
    %c0_0 = arith.constant 0 : index
    %c0_1 = arith.constant 0 : index
    %0 = vector.load %arg1[%c0, %c0_0, %c0_1] : memref<1x17x32xbf16, #tpu.memory_space<vmem>>, vector<1x17x32xbf16>
    %1 = vector.shape_cast %0 : vector<1x17x32xbf16> to vector<17x32xbf16>
    %2 = arith.extf %1 : vector<17x32xbf16> to vector<17x32xf32>
    %c0_2 = arith.constant 0 : index
    %c0_3 = arith.constant 0 : index
    %3 = vector.load %arg2[%c0_2, %c0_3] : memref<17x32xf32, #tpu.memory_space<vmem>>, vector<17x32xf32>
    %4 = arith.addf %2, %3 : vector<17x32xf32>
    %c0_4 = arith.constant 0 : index
    %c0_5 = arith.constant 0 : index
    %5 = vector.load %arg3[%c0_4, %c0_5] : memref<1x32xf32, #tpu.memory_space<vmem>>, vector<1x32xf32>
    %c0_6 = arith.constant 0 : index
    %c0_7 = arith.constant 0 : index
    %6 = vector.load %arg4[%c0_6, %c0_7] : memref<1x32xf32, #tpu.memory_space<vmem>>, vector<1x32xf32>
    %cst = arith.constant dense<0.000000e+00> : vector<17xf32>
    %7 = vector.multi_reduction <add>, %4, %cst [1] : vector<17x32xf32> to vector<17xf32>
    %8 = vector.shape_cast %7 : vector<17xf32> to vector<17x1xf32>
    %cst_8 = arith.constant 3.200000e+01 : f32
    %9 = vector.broadcast %cst_8 : f32 to vector<17x1xf32>
    %10 = arith.divf %8, %9 : vector<17x1xf32>
    %11 = vector.broadcast %10 : vector<17x1xf32> to vector<17x32xf32>
    %12 = arith.subf %4, %11 : vector<17x32xf32>
    %13 = arith.mulf %12, %12 : vector<17x32xf32>
    %cst_9 = arith.constant dense<0.000000e+00> : vector<17xf32>
    %14 = vector.multi_reduction <add>, %13, %cst_9 [1] : vector<17x32xf32> to vector<17xf32>
    %15 = vector.shape_cast %14 : vector<17xf32> to vector<17x1xf32>
    %cst_10 = arith.constant 3.200000e+01 : f32
    %16 = vector.broadcast %cst_10 : f32 to vector<17x1xf32>
    %17 = arith.divf %15, %16 : vector<17x1xf32>
    %18 = vector.broadcast %10 : vector<17x1xf32> to vector<17x32xf32>
    %19 = arith.subf %4, %18 : vector<17x32xf32>
    %cst_11 = arith.constant 9.99999974E-6 : f32
    %20 = vector.broadcast %cst_11 : f32 to vector<17x1xf32>
    %21 = arith.addf %17, %20 : vector<17x1xf32>
    %22 = math.rsqrt %21 : vector<17x1xf32>
    %23 = vector.broadcast %22 : vector<17x1xf32> to vector<17x32xf32>
    %24 = arith.mulf %19, %23 : vector<17x32xf32>
    %25 = vector.broadcast %5 : vector<1x32xf32> to vector<17x32xf32>
    %26 = arith.mulf %24, %25 : vector<17x32xf32>
    %27 = vector.broadcast %6 : vector<1x32xf32> to vector<17x32xf32>
    %28 = arith.addf %26, %27 : vector<17x32xf32>
    %29 = vector.shape_cast %28 : vector<17x32xf32> to vector<1x17x32xf32>
    %30 = arith.truncf %29 : vector<1x17x32xf32> to vector<1x17x32xbf16>
    %c0_12 = arith.constant 0 : index
    %c0_13 = arith.constant 0 : index
    %c0_14 = arith.constant 0 : index
    %31 = vector.load %arg5[%c0_12, %c0_13, %c0_14] : memref<1x17x32xbf16, #tpu.memory_space<vmem>>, vector<1x17x32xbf16>
    tpu.vector_store %arg5[%c0_12, %c0_13, %c0_14], %30 {strides = array<i32>} : memref<1x17x32xbf16, #tpu.memory_space<vmem>>, vector<1x17x32xbf16>,
    return
  }
  func.func @transform_0(%arg0: i32) -> (i32, i32, i32) {
    %c0_i32 = arith.constant 0 : i32
    %c0_i32_0 = arith.constant 0 : i32
    %c0_i32_1 = arith.constant 0 : i32
    return %arg0, %c0_i32, %c0_i32_0 : i32, i32, i32
  }
  func.func @transform_1(%arg0: i32) -> (i32, i32) {
    %c0_i32 = arith.constant 0 : i32
    %c0_i32_0 = arith.constant 0 : i32
    %c0_i32_1 = arith.constant 0 : i32
    return %c0_i32, %c0_i32_0 : i32, i32
  }
  func.func @transform_2(%arg0: i32) -> (i32, i32) {
    %c0_i32 = arith.constant 0 : i32
    %c0_i32_0 = arith.constant 0 : i32
    %c0_i32_1 = arith.constant 0 : i32
    return %c0_i32, %c0_i32_0 : i32, i32
  }
  func.func @transform_3(%arg0: i32) -> (i32, i32) {
    %c0_i32 = arith.constant 0 : i32
    %c0_i32_0 = arith.constant 0 : i32
    %c0_i32_1 = arith.constant 0 : i32
    return %c0_i32, %c0_i32_0 : i32, i32
  }
  func.func @transform_4(%arg0: i32) -> (i32, i32, i32) {
    %c0_i32 = arith.constant 0 : i32
    %c0_i32_0 = arith.constant 0 : i32
    %c0_i32_1 = arith.constant 0 : i32
    return %arg0, %c0_i32, %c0_i32_0 : i32, i32, i32
  }
}

module attributes {stable_mosaic.version = 11 : i64} {
  func.func @resblock_kernel(%arg0: i32, %arg1: memref<1x17x32xbf16, #tpu.memory_space<vmem>>, %arg2: memref<1x32xf32, #tpu.memory_space<vmem>>, %arg3: memref<1x32xf32, #tpu.memory_space<vmem>>, %arg4: memref<32x96xbf16, #tpu.memory_space<vmem>>, %arg5: memref<1x96xf32, #tpu.memory_space<vmem>>, %arg6: memref<4x8x32xbf16, #tpu.memory_space<vmem>>, %arg7: memref<1x32xf32, #tpu.memory_space<vmem>>, %arg8: memref<1x32xf32, #tpu.memory_space<vmem>>, %arg9: memref<1x32xf32, #tpu.memory_space<vmem>>, %arg10: memref<32x128xbf16, #tpu.memory_space<vmem>>, %arg11: memref<1x128xf32, #tpu.memory_space<vmem>>, %arg12: memref<128x32xbf16, #tpu.memory_space<vmem>>, %arg13: memref<1x32xf32, #tpu.memory_space<vmem>>, %arg14: memref<1x17x32xbf16, #tpu.memory_space<vmem>>) attributes {dimension_semantics = [#tpu.dimension_semantics<parallel>], iteration_bounds = array<i64: 2>, scalar_prefetch = 0 : i64, scratch_operands = 0 : i64, tpu.core_type = #tpu.core_type<tc>, window_params = [{transform_indices = @transform_0, window_bounds = array<i64: 1, 17, 32>}, {pipeline_mode = #tpu.pipeline_mode<synchronous>, transform_indices = @transform_1, window_bounds = array<i64: 1, 32>}, {pipeline_mode = #tpu.pipeline_mode<synchronous>, transform_indices = @transform_2, window_bounds = array<i64: 1, 32>}, {pipeline_mode = #tpu.pipeline_mode<synchronous>, transform_indices = @transform_3, window_bounds = array<i64: 32, 96>}, {pipeline_mode = #tpu.pipeline_mode<synchronous>, transform_indices = @transform_4, window_bounds = array<i64: 1, 96>}, {pipeline_mode = #tpu.pipeline_mode<synchronous>, transform_indices = @transform_5, window_bounds = array<i64: 4, 8, 32>}, {pipeline_mode = #tpu.pipeline_mode<synchronous>, transform_indices = @transform_6, window_bounds = array<i64: 1, 32>}, {pipeline_mode = #tpu.pipeline_mode<synchronous>, transform_indices = @transform_7, window_bounds = array<i64: 1, 32>}, {pipeline_mode = #tpu.pipeline_mode<synchronous>, transform_indices = @transform_8, window_bounds = array<i64: 1, 32>}, {pipeline_mode = #tpu.pipeline_mode<synchronous>, transform_indices = @transform_9, window_bounds = array<i64: 32, 128>}, {pipeline_mode = #tpu.pipeline_mode<synchronous>, transform_indices = @transform_10, window_bounds = array<i64: 1, 128>}, {pipeline_mode = #tpu.pipeline_mode<synchronous>, transform_indices = @transform_11, window_bounds = array<i64: 128, 32>}, {pipeline_mode = #tpu.pipeline_mode<synchronous>, transform_indices = @transform_12, window_bounds = array<i64: 1, 32>}, {transform_indices = @transform_13, window_bounds = array<i64: 1, 17, 32>}]} {
    %c0 = arith.constant 0 : index
    %c0_0 = arith.constant 0 : index
    %c0_1 = arith.constant 0 : index
    %0 = vector.load %arg1[%c0, %c0_0, %c0_1] : memref<1x17x32xbf16, #tpu.memory_space<vmem>>, vector<1x17x32xbf16>
    %1 = vector.shape_cast %0 : vector<1x17x32xbf16> to vector<17x32xbf16>
    %2 = arith.extf %1 : vector<17x32xbf16> to vector<17x32xf32>
    %c0_2 = arith.constant 0 : index
    %c0_3 = arith.constant 0 : index
    %3 = vector.load %arg2[%c0_2, %c0_3] : memref<1x32xf32, #tpu.memory_space<vmem>>, vector<1x32xf32>
    %c0_4 = arith.constant 0 : index
    %c0_5 = arith.constant 0 : index
    %4 = vector.load %arg3[%c0_4, %c0_5] : memref<1x32xf32, #tpu.memory_space<vmem>>, vector<1x32xf32>
    %cst = arith.constant dense<0.000000e+00> : vector<17xf32>
    %5 = vector.multi_reduction <add>, %2, %cst [1] : vector<17x32xf32> to vector<17xf32>
    %6 = vector.shape_cast %5 : vector<17xf32> to vector<17x1xf32>
    %cst_6 = arith.constant 3.200000e+01 : f32
    %7 = vector.broadcast %cst_6 : f32 to vector<17x1xf32>
    %8 = arith.divf %6, %7 : vector<17x1xf32>
    %9 = vector.broadcast %8 : vector<17x1xf32> to vector<17x32xf32>
    %10 = arith.subf %2, %9 : vector<17x32xf32>
    %11 = arith.mulf %10, %10 : vector<17x32xf32>
    %cst_7 = arith.constant dense<0.000000e+00> : vector<17xf32>
    %12 = vector.multi_reduction <add>, %11, %cst_7 [1] : vector<17x32xf32> to vector<17xf32>
    %13 = vector.shape_cast %12 : vector<17xf32> to vector<17x1xf32>
    %cst_8 = arith.constant 3.200000e+01 : f32
    %14 = vector.broadcast %cst_8 : f32 to vector<17x1xf32>
    %15 = arith.divf %13, %14 : vector<17x1xf32>
    %16 = vector.broadcast %8 : vector<17x1xf32> to vector<17x32xf32>
    %17 = arith.subf %2, %16 : vector<17x32xf32>
    %cst_9 = arith.constant 9.99999974E-6 : f32
    %18 = vector.broadcast %cst_9 : f32 to vector<17x1xf32>
    %19 = arith.addf %15, %18 : vector<17x1xf32>
    %20 = math.rsqrt %19 : vector<17x1xf32>
    %21 = vector.broadcast %20 : vector<17x1xf32> to vector<17x32xf32>
    %22 = arith.mulf %17, %21 : vector<17x32xf32>
    %23 = vector.broadcast %3 : vector<1x32xf32> to vector<17x32xf32>
    %24 = arith.mulf %22, %23 : vector<17x32xf32>
    %25 = vector.broadcast %4 : vector<1x32xf32> to vector<17x32xf32>
    %26 = arith.addf %24, %25 : vector<17x32xf32>
    %27 = arith.truncf %26 : vector<17x32xf32> to vector<17x32xbf16>
    %c0_10 = arith.constant 0 : index
    %c0_11 = arith.constant 0 : index
    %28 = vector.load %arg4[%c0_10, %c0_11] : memref<32x96xbf16, #tpu.memory_space<vmem>>, vector<32x96xbf16>
    %cst_12 = arith.constant dense<0.000000e+00> : vector<17x96xf32>
    %29 = tpu.matmul %27, %28, %cst_12 {dimension_numbers = #tpu.dot_dimension_numbers<[1], [0], [0], [1], [0, 0, 1, 1], [], []>} : vector<17x32xbf16>, vector<32x96xbf16>, vector<17x96xf32> -> vector<17x96xf32>
    %c0_13 = arith.constant 0 : index
    %c0_14 = arith.constant 0 : index
    %30 = vector.load %arg5[%c0_13, %c0_14] : memref<1x96xf32, #tpu.memory_space<vmem>>, vector<1x96xf32>
    %31 = vector.broadcast %30 : vector<1x96xf32> to vector<17x96xf32>
    %32 = arith.addf %29, %31 : vector<17x96xf32>
    %33 = vector.extract_strided_slice %32 {offsets = [0, 0], sizes = [17, 32], strides = [1, 1]} : vector<17x96xf32> to vector<17x32xf32>
    %34 = vector.extract_strided_slice %33 {offsets = [0, 0], sizes = [17, 8], strides = [1, 1]} : vector<17x32xf32> to vector<17x8xf32>
    %35 = vector.extract_strided_slice %33 {offsets = [0, 8], sizes = [17, 8], strides = [1, 1]} : vector<17x32xf32> to vector<17x8xf32>
    %36 = vector.extract_strided_slice %33 {offsets = [0, 16], sizes = [17, 8], strides = [1, 1]} : vector<17x32xf32> to vector<17x8xf32>
    %37 = vector.extract_strided_slice %33 {offsets = [0, 24], sizes = [17, 8], strides = [1, 1]} : vector<17x32xf32> to vector<17x8xf32>
    %38 = vector.shape_cast %34 : vector<17x8xf32> to vector<1x17x8xf32>
    %39 = vector.shape_cast %35 : vector<17x8xf32> to vector<1x17x8xf32>
    %40 = vector.shape_cast %36 : vector<17x8xf32> to vector<1x17x8xf32>
    %41 = vector.shape_cast %37 : vector<17x8xf32> to vector<1x17x8xf32>
    %42 = tpu.concatenate %38, %39, %40, %41 in 0 : vector<1x17x8xf32>, vector<1x17x8xf32>, vector<1x17x8xf32>, vector<1x17x8xf32> -> vector<4x17x8xf32>
    %43 = arith.truncf %42 : vector<4x17x8xf32> to vector<4x17x8xbf16>
    %44 = vector.extract_strided_slice %32 {offsets = [0, 32], sizes = [17, 32], strides = [1, 1]} : vector<17x96xf32> to vector<17x32xf32>
    %45 = vector.extract_strided_slice %44 {offsets = [0, 0], sizes = [17, 8], strides = [1, 1]} : vector<17x32xf32> to vector<17x8xf32>
    %46 = vector.extract_strided_slice %44 {offsets = [0, 8], sizes = [17, 8], strides = [1, 1]} : vector<17x32xf32> to vector<17x8xf32>
    %47 = vector.extract_strided_slice %44 {offsets = [0, 16], sizes = [17, 8], strides = [1, 1]} : vector<17x32xf32> to vector<17x8xf32>
    %48 = vector.extract_strided_slice %44 {offsets = [0, 24], sizes = [17, 8], strides = [1, 1]} : vector<17x32xf32> to vector<17x8xf32>
    %49 = vector.shape_cast %45 : vector<17x8xf32> to vector<1x17x8xf32>
    %50 = vector.shape_cast %46 : vector<17x8xf32> to vector<1x17x8xf32>
    %51 = vector.shape_cast %47 : vector<17x8xf32> to vector<1x17x8xf32>
    %52 = vector.shape_cast %48 : vector<17x8xf32> to vector<1x17x8xf32>
    %53 = tpu.concatenate %49, %50, %51, %52 in 0 : vector<1x17x8xf32>, vector<1x17x8xf32>, vector<1x17x8xf32>, vector<1x17x8xf32> -> vector<4x17x8xf32>
    %54 = arith.truncf %53 : vector<4x17x8xf32> to vector<4x17x8xbf16>
    %55 = vector.extract_strided_slice %32 {offsets = [0, 64], sizes = [17, 32], strides = [1, 1]} : vector<17x96xf32> to vector<17x32xf32>
    %56 = vector.extract_strided_slice %55 {offsets = [0, 0], sizes = [17, 8], strides = [1, 1]} : vector<17x32xf32> to vector<17x8xf32>
    %57 = vector.extract_strided_slice %55 {offsets = [0, 8], sizes = [17, 8], strides = [1, 1]} : vector<17x32xf32> to vector<17x8xf32>
    %58 = vector.extract_strided_slice %55 {offsets = [0, 16], sizes = [17, 8], strides = [1, 1]} : vector<17x32xf32> to vector<17x8xf32>
    %59 = vector.extract_strided_slice %55 {offsets = [0, 24], sizes = [17, 8], strides = [1, 1]} : vector<17x32xf32> to vector<17x8xf32>
    %60 = vector.shape_cast %56 : vector<17x8xf32> to vector<1x17x8xf32>
    %61 = vector.shape_cast %57 : vector<17x8xf32> to vector<1x17x8xf32>
    %62 = vector.shape_cast %58 : vector<17x8xf32> to vector<1x17x8xf32>
    %63 = vector.shape_cast %59 : vector<17x8xf32> to vector<1x17x8xf32>
    %64 = tpu.concatenate %60, %61, %62, %63 in 0 : vector<1x17x8xf32>, vector<1x17x8xf32>, vector<1x17x8xf32>, vector<1x17x8xf32> -> vector<4x17x8xf32>
    %65 = arith.truncf %64 : vector<4x17x8xf32> to vector<4x17x8xbf16>
    "tpu.trace_start"() <{level = 10 : i32, message = "hqd,hkd->hqk"}> : () -> ()
    %cst_15 = arith.constant dense<0.000000e+00> : vector<4x17x17xf32>
    %66 = tpu.matmul %43, %54, %cst_15 {dimension_numbers = #tpu.dot_dimension_numbers<[2], [2], [1], [1], [0, 0, 0, 1, 1, 1], [0], [0]>} : vector<4x17x8xbf16>, vector<4x17x8xbf16>, vector<4x17x17xf32> -> vector<4x17x17xf32>
    "tpu.trace_stop"() : () -> ()
    %cst_16 = arith.constant dense<0xFF800000> : vector<4x17xf32>
    %67 = vector.multi_reduction <maximumf>, %66, %cst_16 [2] : vector<4x17x17xf32> to vector<4x17xf32>
    %68 = vector.shape_cast %67 : vector<4x17xf32> to vector<4x17x1xf32>
    %69 = vector.broadcast %68 : vector<4x17x1xf32> to vector<4x17x17xf32>
    %70 = arith.subf %66, %69 : vector<4x17x17xf32>
    %71 = math.exp %70 : vector<4x17x17xf32>
    %cst_17 = arith.constant dense<0.000000e+00> : vector<4x17xf32>
    %72 = vector.multi_reduction <add>, %71, %cst_17 [2] : vector<4x17x17xf32> to vector<4x17xf32>
    %73 = vector.shape_cast %72 : vector<4x17xf32> to vector<4x17x1xf32>
    %74 = tpu.reciprocal %73 {approx = true} : vector<4x17x1xf32> -> vector<4x17x1xf32>
    %75 = vector.broadcast %74 : vector<4x17x1xf32> to vector<4x17x17xf32>
    %76 = arith.mulf %71, %75 : vector<4x17x17xf32>
    %77 = arith.truncf %76 : vector<4x17x17xf32> to vector<4x17x17xbf16>
    "tpu.trace_start"() <{level = 10 : i32, message = "hqk,hkd->hqd"}> : () -> ()
    %cst_18 = arith.constant dense<0.000000e+00> : vector<4x17x8xf32>
    %78 = tpu.matmul %77, %65, %cst_18 {dimension_numbers = #tpu.dot_dimension_numbers<[2], [1], [1], [2], [0, 0, 0, 1, 1, 2], [0], [0]>} : vector<4x17x17xbf16>, vector<4x17x8xbf16>, vector<4x17x8xf32> -> vector<4x17x8xf32>
    "tpu.trace_stop"() : () -> ()
    %79 = arith.truncf %78 : vector<4x17x8xf32> to vector<4x17x8xbf16>
    %c0_19 = arith.constant 0 : index
    %c0_20 = arith.constant 0 : index
    %c0_21 = arith.constant 0 : index
    %80 = vector.load %arg6[%c0_19, %c0_20, %c0_21] : memref<4x8x32xbf16, #tpu.memory_space<vmem>>, vector<4x8x32xbf16>
    "tpu.trace_start"() <{level = 10 : i32, message = "hqd,hdm->hqm"}> : () -> ()
    %cst_22 = arith.constant dense<0.000000e+00> : vector<4x17x32xf32>
    %81 = tpu.matmul %79, %80, %cst_22 {dimension_numbers = #tpu.dot_dimension_numbers<[2], [1], [1], [2], [0, 0, 0, 1, 1, 2], [0], [0]>} : vector<4x17x8xbf16>, vector<4x8x32xbf16>, vector<4x17x32xf32> -> vector<4x17x32xf32>
    "tpu.trace_stop"() : () -> ()
    %cst_23 = arith.constant dense<0.000000e+00> : vector<17x32xf32>
    %82 = vector.multi_reduction <add>, %81, %cst_23 [0] : vector<4x17x32xf32> to vector<17x32xf32>
    %83 = arith.addf %2, %82 : vector<17x32xf32>
    %c0_24 = arith.constant 0 : index
    %c0_25 = arith.constant 0 : index
    %84 = vector.load %arg7[%c0_24, %c0_25] : memref<1x32xf32, #tpu.memory_space<vmem>>, vector<1x32xf32>
    %85 = vector.broadcast %84 : vector<1x32xf32> to vector<17x32xf32>
    %86 = arith.addf %83, %85 : vector<17x32xf32>
    %c0_26 = arith.constant 0 : index
    %c0_27 = arith.constant 0 : index
    %87 = vector.load %arg8[%c0_26, %c0_27] : memref<1x32xf32, #tpu.memory_space<vmem>>, vector<1x32xf32>
    %c0_28 = arith.constant 0 : index
    %c0_29 = arith.constant 0 : index
    %88 = vector.load %arg9[%c0_28, %c0_29] : memref<1x32xf32, #tpu.memory_space<vmem>>, vector<1x32xf32>
    %cst_30 = arith.constant dense<0.000000e+00> : vector<17xf32>
    %89 = vector.multi_reduction <add>, %86, %cst_30 [1] : vector<17x32xf32> to vector<17xf32>
    %90 = vector.shape_cast %89 : vector<17xf32> to vector<17x1xf32>
    %cst_31 = arith.constant 3.200000e+01 : f32
    %91 = vector.broadcast %cst_31 : f32 to vector<17x1xf32>
    %92 = arith.divf %90, %91 : vector<17x1xf32>
    %93 = vector.broadcast %92 : vector<17x1xf32> to vector<17x32xf32>
    %94 = arith.subf %86, %93 : vector<17x32xf32>
    %95 = arith.mulf %94, %94 : vector<17x32xf32>
    %cst_32 = arith.constant dense<0.000000e+00> : vector<17xf32>
    %96 = vector.multi_reduction <add>, %95, %cst_32 [1] : vector<17x32xf32> to vector<17xf32>
    %97 = vector.shape_cast %96 : vector<17xf32> to vector<17x1xf32>
    %cst_33 = arith.constant 3.200000e+01 : f32
    %98 = vector.broadcast %cst_33 : f32 to vector<17x1xf32>
    %99 = arith.divf %97, %98 : vector<17x1xf32>
    %100 = vector.broadcast %92 : vector<17x1xf32> to vector<17x32xf32>
    %101 = arith.subf %86, %100 : vector<17x32xf32>
    %cst_34 = arith.constant 9.99999974E-6 : f32
    %102 = vector.broadcast %cst_34 : f32 to vector<17x1xf32>
    %103 = arith.addf %99, %102 : vector<17x1xf32>
    %104 = math.rsqrt %103 : vector<17x1xf32>
    %105 = vector.broadcast %104 : vector<17x1xf32> to vector<17x32xf32>
    %106 = arith.mulf %101, %105 : vector<17x32xf32>
    %107 = vector.broadcast %87 : vector<1x32xf32> to vector<17x32xf32>
    %108 = arith.mulf %106, %107 : vector<17x32xf32>
    %109 = vector.broadcast %88 : vector<1x32xf32> to vector<17x32xf32>
    %110 = arith.addf %108, %109 : vector<17x32xf32>
    %111 = arith.truncf %110 : vector<17x32xf32> to vector<17x32xbf16>
    %c0_35 = arith.constant 0 : index
    %c0_36 = arith.constant 0 : index
    %112 = vector.load %arg10[%c0_35, %c0_36] : memref<32x128xbf16, #tpu.memory_space<vmem>>, vector<32x128xbf16>
    %cst_37 = arith.constant dense<0.000000e+00> : vector<17x128xf32>
    %113 = tpu.matmul %111, %112, %cst_37 {dimension_numbers = #tpu.dot_dimension_numbers<[1], [0], [0], [1], [0, 0, 1, 1], [], []>} : vector<17x32xbf16>, vector<32x128xbf16>, vector<17x128xf32> -> vector<17x128xf32>
    %c0_38 = arith.constant 0 : index
    %c0_39 = arith.constant 0 : index
    %114 = vector.load %arg11[%c0_38, %c0_39] : memref<1x128xf32, #tpu.memory_space<vmem>>, vector<1x128xf32>
    %115 = vector.broadcast %114 : vector<1x128xf32> to vector<17x128xf32>
    %116 = arith.addf %113, %115 : vector<17x128xf32>
    %cst_40 = arith.constant 1.702000e+00 : f32
    %117 = vector.broadcast %cst_40 : f32 to vector<17x128xf32>
    %118 = arith.mulf %117, %116 : vector<17x128xf32>
    %119 = arith.negf %118 : vector<17x128xf32>
    %120 = math.exp %119 : vector<17x128xf32>
    %cst_41 = arith.constant 1.000000e+00 : f32
    %121 = vector.broadcast %cst_41 : f32 to vector<17x128xf32>
    %122 = arith.addf %121, %120 : vector<17x128xf32>
    %123 = arith.divf %121, %122 : vector<17x128xf32>
    %124 = arith.mulf %116, %123 : vector<17x128xf32>
    %125 = arith.truncf %124 : vector<17x128xf32> to vector<17x128xbf16>
    %c0_42 = arith.constant 0 : index
    %c0_43 = arith.constant 0 : index
    %126 = vector.load %arg12[%c0_42, %c0_43] : memref<128x32xbf16, #tpu.memory_space<vmem>>, vector<128x32xbf16>
    %cst_44 = arith.constant dense<0.000000e+00> : vector<17x32xf32>
    %127 = tpu.matmul %125, %126, %cst_44 {dimension_numbers = #tpu.dot_dimension_numbers<[1], [0], [0], [1], [0, 0, 1, 1], [], []>} : vector<17x128xbf16>, vector<128x32xbf16>, vector<17x32xf32> -> vector<17x32xf32>
    %c0_45 = arith.constant 0 : index
    %c0_46 = arith.constant 0 : index
    %128 = vector.load %arg13[%c0_45, %c0_46] : memref<1x32xf32, #tpu.memory_space<vmem>>, vector<1x32xf32>
    %129 = vector.broadcast %128 : vector<1x32xf32> to vector<17x32xf32>
    %130 = arith.addf %127, %129 : vector<17x32xf32>
    %131 = arith.addf %86, %130 : vector<17x32xf32>
    %132 = vector.shape_cast %131 : vector<17x32xf32> to vector<1x17x32xf32>
    %133 = arith.truncf %132 : vector<1x17x32xf32> to vector<1x17x32xbf16>
    %c0_47 = arith.constant 0 : index
    %c0_48 = arith.constant 0 : index
    %c0_49 = arith.constant 0 : index
    %134 = vector.load %arg14[%c0_47, %c0_48, %c0_49] : memref<1x17x32xbf16, #tpu.memory_space<vmem>>, vector<1x17x32xbf16>
    tpu.vector_store %arg14[%c0_47, %c0_48, %c0_49], %133 {strides = array<i32>} : memref<1x17x32xbf16, #tpu.memory_space<vmem>>, vector<1x17x32xbf16>,
    return
  }
  func.func @transform_0(%arg0: i32) -> (i32, i32, i32) {
    %c0_i32 = arith.constant 0 : i32
    %c0_i32_0 = arith.constant 0 : i32
    %c0_i32_1 = arith.constant 0 : i32
    return %arg0, %c0_i32, %c0_i32_0 : i32, i32, i32
  }
  func.func @transform_1(%arg0: i32) -> (i32, i32) {
    %c0_i32 = arith.constant 0 : i32
    %c0_i32_0 = arith.constant 0 : i32
    %c0_i32_1 = arith.constant 0 : i32
    return %c0_i32, %c0_i32_0 : i32, i32
  }
  func.func @transform_2(%arg0: i32) -> (i32, i32) {
    %c0_i32 = arith.constant 0 : i32
    %c0_i32_0 = arith.constant 0 : i32
    %c0_i32_1 = arith.constant 0 : i32
    return %c0_i32, %c0_i32_0 : i32, i32
  }
  func.func @transform_3(%arg0: i32) -> (i32, i32) {
    %c0_i32 = arith.constant 0 : i32
    %c0_i32_0 = arith.constant 0 : i32
    %c0_i32_1 = arith.constant 0 : i32
    return %c0_i32, %c0_i32_0 : i32, i32
  }
  func.func @transform_4(%arg0: i32) -> (i32, i32) {
    %c0_i32 = arith.constant 0 : i32
    %c0_i32_0 = arith.constant 0 : i32
    %c0_i32_1 = arith.constant 0 : i32
    return %c0_i32, %c0_i32_0 : i32, i32
  }
  func.func @transform_5(%arg0: i32) -> (i32, i32, i32) {
    %c0_i32 = arith.constant 0 : i32
    %c0_i32_0 = arith.constant 0 : i32
    %c0_i32_1 = arith.constant 0 : i32
    %c0_i32_2 = arith.constant 0 : i32
    return %c0_i32, %c0_i32_0, %c0_i32_1 : i32, i32, i32
  }
  func.func @transform_6(%arg0: i32) -> (i32, i32) {
    %c0_i32 = arith.constant 0 : i32
    %c0_i32_0 = arith.constant 0 : i32
    %c0_i32_1 = arith.constant 0 : i32
    return %c0_i32, %c0_i32_0 : i32, i32
  }
  func.func @transform_7(%arg0: i32) -> (i32, i32) {
    %c0_i32 = arith.constant 0 : i32
    %c0_i32_0 = arith.constant 0 : i32
    %c0_i32_1 = arith.constant 0 : i32
    return %c0_i32, %c0_i32_0 : i32, i32
  }
  func.func @transform_8(%arg0: i32) -> (i32, i32) {
    %c0_i32 = arith.constant 0 : i32
    %c0_i32_0 = arith.constant 0 : i32
    %c0_i32_1 = arith.constant 0 : i32
    return %c0_i32, %c0_i32_0 : i32, i32
  }
  func.func @transform_9(%arg0: i32) -> (i32, i32) {
    %c0_i32 = arith.constant 0 : i32
    %c0_i32_0 = arith.constant 0 : i32
    %c0_i32_1 = arith.constant 0 : i32
    return %c0_i32, %c0_i32_0 : i32, i32
  }
  func.func @transform_10(%arg0: i32) -> (i32, i32) {
    %c0_i32 = arith.constant 0 : i32
    %c0_i32_0 = arith.constant 0 : i32
    %c0_i32_1 = arith.constant 0 : i32
    return %c0_i32, %c0_i32_0 : i32, i32
  }
  func.func @transform_11(%arg0: i32) -> (i32, i32) {
    %c0_i32 = arith.constant 0 : i32
    %c0_i32_0 = arith.constant 0 : i32
    %c0_i32_1 = arith.constant 0 : i32
    return %c0_i32, %c0_i32_0 : i32, i32
  }
  func.func @transform_12(%arg0: i32) -> (i32, i32) {
    %c0_i32 = arith.constant 0 : i32
    %c0_i32_0 = arith.constant 0 : i32
    %c0_i32_1 = arith.constant 0 : i32
    return %c0_i32, %c0_i32_0 : i32, i32
  }
  func.func @transform_13(%arg0: i32) -> (i32, i32, i32) {
    %c0_i32 = arith.constant 0 : i32
    %c0_i32_0 = arith.constant 0 : i32
    %c0_i32_1 = arith.constant 0 : i32
    return %arg0, %c0_i32, %c0_i32_0 : i32, i32, i32
  }
}

module attributes {stable_mosaic.version = 11 : i64} {
  func.func @post_proj_kernel(%arg0: memref<2x32xbf16, #tpu.memory_space<vmem>>, %arg1: memref<1x32xf32, #tpu.memory_space<vmem>>, %arg2: memref<1x32xf32, #tpu.memory_space<vmem>>, %arg3: memref<32x16xbf16, #tpu.memory_space<vmem>>, %arg4: memref<2x16xf32, #tpu.memory_space<vmem>>) attributes {dimension_semantics = [], scalar_prefetch = 0 : i64, scratch_operands = 0 : i64, tpu.core_type = #tpu.core_type<tc>} {
    %c0 = arith.constant 0 : index
    %c0_0 = arith.constant 0 : index
    %0 = vector.load %arg0[%c0, %c0_0] : memref<2x32xbf16, #tpu.memory_space<vmem>>, vector<2x32xbf16>
    %c0_1 = arith.constant 0 : index
    %c0_2 = arith.constant 0 : index
    %1 = vector.load %arg1[%c0_1, %c0_2] : memref<1x32xf32, #tpu.memory_space<vmem>>, vector<1x32xf32>
    %c0_3 = arith.constant 0 : index
    %c0_4 = arith.constant 0 : index
    %2 = vector.load %arg2[%c0_3, %c0_4] : memref<1x32xf32, #tpu.memory_space<vmem>>, vector<1x32xf32>
    %3 = arith.extf %0 : vector<2x32xbf16> to vector<2x32xf32>
    %cst = arith.constant dense<0.000000e+00> : vector<2xf32>
    %4 = vector.multi_reduction <add>, %3, %cst [1] : vector<2x32xf32> to vector<2xf32>
    %5 = vector.shape_cast %4 : vector<2xf32> to vector<2x1xf32>
    %cst_5 = arith.constant 3.200000e+01 : f32
    %6 = vector.broadcast %cst_5 : f32 to vector<2x1xf32>
    %7 = arith.divf %5, %6 : vector<2x1xf32>
    %8 = vector.broadcast %7 : vector<2x1xf32> to vector<2x32xf32>
    %9 = arith.subf %3, %8 : vector<2x32xf32>
    %10 = arith.mulf %9, %9 : vector<2x32xf32>
    %cst_6 = arith.constant dense<0.000000e+00> : vector<2xf32>
    %11 = vector.multi_reduction <add>, %10, %cst_6 [1] : vector<2x32xf32> to vector<2xf32>
    %12 = vector.shape_cast %11 : vector<2xf32> to vector<2x1xf32>
    %cst_7 = arith.constant 3.200000e+01 : f32
    %13 = vector.broadcast %cst_7 : f32 to vector<2x1xf32>
    %14 = arith.divf %12, %13 : vector<2x1xf32>
    %15 = vector.broadcast %7 : vector<2x1xf32> to vector<2x32xf32>
    %16 = arith.subf %3, %15 : vector<2x32xf32>
    %cst_8 = arith.constant 9.99999974E-6 : f32
    %17 = vector.broadcast %cst_8 : f32 to vector<2x1xf32>
    %18 = arith.addf %14, %17 : vector<2x1xf32>
    %19 = math.rsqrt %18 : vector<2x1xf32>
    %20 = vector.broadcast %19 : vector<2x1xf32> to vector<2x32xf32>
    %21 = arith.mulf %16, %20 : vector<2x32xf32>
    %22 = vector.broadcast %1 : vector<1x32xf32> to vector<2x32xf32>
    %23 = arith.mulf %21, %22 : vector<2x32xf32>
    %24 = vector.broadcast %2 : vector<1x32xf32> to vector<2x32xf32>
    %25 = arith.addf %23, %24 : vector<2x32xf32>
    %26 = arith.truncf %25 : vector<2x32xf32> to vector<2x32xbf16>
    %c0_9 = arith.constant 0 : index
    %c0_10 = arith.constant 0 : index
    %27 = vector.load %arg3[%c0_9, %c0_10] : memref<32x16xbf16, #tpu.memory_space<vmem>>, vector<32x16xbf16>
    %cst_11 = arith.constant dense<0.000000e+00> : vector<2x16xf32>
    %28 = tpu.matmul %26, %27, %cst_11 {dimension_numbers = #tpu.dot_dimension_numbers<[1], [0], [0], [1], [0, 0, 1, 1], [], []>} : vector<2x32xbf16>, vector<32x16xbf16>, vector<2x16xf32> -> vector<2x16xf32>
    %c0_12 = arith.constant 0 : index
    %c0_13 = arith.constant 0 : index
    %29 = vector.load %arg4[%c0_12, %c0_13] : memref<2x16xf32, #tpu.memory_space<vmem>>, vector<2x16xf32>
    tpu.vector_store %arg4[%c0_12, %c0_13], %28 {strides = array<i32>} : memref<2x16xf32, #tpu.memory_space<vmem>>, vector<2x16xf32>,
    return
  }
}

</mosaic_0001>

<bundles_post_ra>
// kernel: vision_transformer_forward.6
= control target key start
LH: loop header
LB: loop body
LE: loop exit
PB: predicated region body
PF: predicated region fallthrough
CT: control target
= control target key end

     0   :  { %s433_s15 = smov 0   ;;  %s490_s0 = inlined_call_operand.vmem [shape: bf16[2,17,32], index: 0, kind: input, shape index: {}]   ;;  %s491_s1 = inlined_call_operand.vmem [shape: f32[17,32], index: 1, kind: input, shape index: {}]   ;;  %s492_s2 = inlined_call_operand.vmem [shape: f32[1,32], index: 2, kind: input, shape index: {}]   ;;  %s493_s3 = inlined_call_operand.vmem [shape: f32[1,32], index: 3, kind: input, shape index: {}]   ;;  %s494_s4 = inlined_call_operand.vmem [shape: bf16[2,17,32], index: 4, kind: output, shape index: {}]  }
   0x1 LB: > { %s366_s16 = sadd.s32 4294967295, %s405_s15   ;;  %p370_p0 = scmp.ge.s32.totalorder %s405_s15, 1  ;;  %s405_s15 = sphi %s433_s15, %s14_s15  }
   0x2   : > { %p162_p1 = scmp.lt.s32.totalorder %s405_s15, 3 }
   0x4   : > { %p163_p2 = pnand %p370_p0, %p162_p1 }
   0x5   : > { %p188_p3 = scmp.lt.s32.totalorder (!%p163_p2), %s366_s16, 1 }
   0x6   : > { %166 = sbr.rel (%p163_p2) target bundleno = 307 (0x133), region = 36 }
   0xb   : > { %s496_s16 = smov (!%p188_p3, %s366_s16), 1  ;;  %v206_v0 = vld [vmem:[%s491_s1 + $0x10] sm:$0x1]  ;;  %v205_v3 = vld [vmem:[%s491_s1 + $0x8] sm:$0xff]  ;;  %vm219_vm0 = vcmask 253952   ;;  %v204_v9 = vld [vmem:[%s491_s1] sm:$0xff] }
   0xc   : > { %s379_s17 = smul.u32 12, %s496_s16  ;;  %vm212_vm1 = vcmask 261120   ;;  %v407_v14 = vmov 32.0   ;;  %v389_v53 = vld [vmem:[%s492_s2] ss:$0 sm:$0xff]  ;;  %vm302_vm12 = vcmask 257024  }
   0xd   : > { %391 = vrcp.f32 %v407_v14  ;;  %v390_v56 = vld [vmem:[%s493_s3] ss:$0 sm:$0xff]  ;;  %vm306_vm6 = vsmask.f32 256 }
   0xe   : > { %s192_s20 = scalar_lea.vmem %s490_s0, %s379_s17  ;;  %s479_s7 = scalar_lea.vmem %s494_s4, %s379_s17  ;;  %vm307_vm8 = vmand %vm219_vm0, %vm306_vm6 }
   0xf   : > { %v200_v1 = vld [vmem:[%s192_s20 + $0x8] sm:$0x1]  ;;  %v376_v2 = vld [vmem:[%s192_s20] sm:$0xff]  }
  0x10   : > { %v203_v4 = vunpack.c.l.bf16 %v200_v1  ;;  %v378_v5 = vunpack.c.h.bf16 %v376_v2  ;;  %v377_v7 = vunpack.c.l.bf16 %v376_v2  ;;  %v308_v63 = vld [vmem:[%s479_s7 + $0x8] sm:$0x1] }
  0x12   : > { %v209_v6 = vadd.f32 %v206_v0, %v203_v4  ;;  %v208_v8 = vadd.f32 %v378_v5, %v205_v3  ;;  %v207_v12 = vadd.f32 %v377_v7, %v204_v9 }
  0x13   : > { %v392_v15 = vpop.eup %391 }
  0x14   : > { %v220_v10 = vsel %vm219_vm0, %v209_v6, 0.0  ;;  %v216_v11 = vsel %vm212_vm1, %v208_v8, 0.0  ;;  %v213_v13 = vsel %vm212_vm1, %v207_v12, 0.0  ;;  %v224_v16 = vmul.f32 32.0, %v392_v15 }
  0x15   : > { %221 = vadd.xlane.f32.xlu0 %v220_v10  ;;  %217 = vadd.xlane.f32.xlu1 %v216_v11  ;;  %vm228_vm2 = vweird.f32 %v392_v15 }
  0x16   : > { %v225_v17 = vsub.f32 1.0, %v224_v16 }
  0x18   : > { %v226_v18 = vmul.f32 %v392_v15, %v225_v17 }
  0x1a   : > { %v227_v19 = vadd.f32 %v392_v15, %v226_v18 }
  0x1c   : > { %v229_v20 = vsel %vm228_vm2, %v392_v15, %v227_v19 }
  0x1d   : > { %214 = vadd.xlane.f32.xlu0 %v213_v13 }
  0x88   : > { %v222_v21 = vpop.xlane.xlu0 %221  ;;  %v218_v25 = vpop.xlane.xlu1 %217 }
  0x89   : > { %v232_v22 = vmul.f32 %v229_v20, %v222_v21  ;;  %v231_v29 = vmul.f32 %v229_v20, %v218_v25 }
  0x8b   : > { %v235_v23 = vsub.f32 %v209_v6, %v232_v22  ;;  %v462_v31 = vsub.f32 %v208_v8, %v231_v29 }
  0x8d   : > { %v238_v24 = vmul.f32 %v235_v23, %v235_v23  ;;  %v237_v34 = vmul.f32 %v462_v31, %v462_v31 }
  0x8f   : > { %v245_v26 = vsel %vm219_vm0, %v238_v24, 0.0  ;;  %v242_v35 = vsel %vm212_vm1, %v237_v34, 0.0 }
  0x90   : > { %246 = vadd.xlane.f32.xlu1 %v245_v26  ;;  %v215_v27 = vpop.xlane.xlu0 %214 }
  0x91   : > { %v230_v28 = vmul.f32 %v229_v20, %v215_v27 }
  0x93   : > { %v233_v30 = vsub.f32 %v207_v12, %v230_v28 }
  0x95   : > { %v236_v32 = vmul.f32 %v233_v30, %v233_v30 }
  0x97   : > { %v239_v33 = vsel %vm212_vm1, %v236_v32, 0.0 }
  0x98   : > { %240 = vadd.xlane.f32.xlu2 %v239_v33 }
  0xa0   : > { %243 = vadd.xlane.f32.xlu2 %v242_v35 }
 0x103   : > { %v247_v36 = vpop.xlane.xlu1 %246 }
 0x104   : > { %v250_v37 = vmul.f32 %v247_v36, %v229_v20 }
 0x106   : > { %v253_v38 = vadd.f32 1e-05, %v250_v37 }
 0x108   : > { %393 = vrsqrt.f32 %v253_v38  ;;  %vm280_vm4 = vweird.f32 %v253_v38 }
 0x10b   : > { %v241_v39 = vpop.xlane.xlu2 %240 }
 0x10c   : > { %v248_v40 = vmul.f32 %v241_v39, %v229_v20 }
 0x10e   : > { %v394_v41 = vpop.eup %393  ;;  %v251_v42 = vadd.f32 1e-05, %v248_v40 }
 0x10f   : > { %v275_v43 = vmul.f32 %v394_v41, %v253_v38  ;;  %vm281_vm3 = vweird.f32 %v394_v41 }
 0x110   : > { %395 = vrsqrt.f32 %v251_v42  ;;  %vm282_vm5 = vmor %vm280_vm4, %vm281_vm3  ;;  %vm260_vm9 = vweird.f32 %v251_v42 }
 0x111   : > { %v276_v44 = vmul.f32 %v394_v41, %v275_v43 }
 0x113   : > { %v277_v45 = vmul.f32 0.5, %v276_v44  ;;  %v244_v46 = vpop.xlane.xlu2 %243 }
 0x114   : > { %v249_v47 = vmul.f32 %v244_v46, %v229_v20 }
 0x115   : > { %v278_v48 = vsub.f32 1.5, %v277_v45 }
 0x116   : > { %v396_v49 = vpop.eup %395  ;;  %v252_v50 = vadd.f32 1e-05, %v249_v47 }
 0x117   : > { %v279_v51 = vmul.f32 %v394_v41, %v278_v48  ;;  %v255_v52 = vmul.f32 %v396_v49, %v251_v42  ;;  %vm261_vm7 = vweird.f32 %v396_v49 }
 0x118   : > { %397 = vrsqrt.f32 %v252_v50  ;;  %vm262_vm10 = vmor %vm260_vm9, %vm261_vm7  ;;  %vm270_vm13 = vweird.f32 %v252_v50 }
 0x119   : > { %v283_v54 = vsel %vm282_vm5, %v394_v41, %v279_v51  ;;  %v256_v55 = vmul.f32 %v396_v49, %v255_v52 }
 0x11a   : > { %v286_v57 = vmul.f32 %v283_v54, %v235_v23 }
 0x11b   : > { %v257_v58 = vmul.f32 0.5, %v256_v55 }
 0x11c   : > { %v292_v59 = vmul.f32 %v389_v53, %v286_v57 }
 0x11d   : > { %v258_v60 = vsub.f32 1.5, %v257_v58 }
 0x11e   : > { %v398_v61 = vpop.eup %397  ;;  %v298_v62 = vadd.f32 %v390_v56, %v292_v59 }
 0x11f   : > { %v259_v0 = vmul.f32 %v396_v49, %v258_v60  ;;  %v265_v1 = vmul.f32 %v398_v61, %v252_v50  ;;  %vm271_vm11 = vweird.f32 %v398_v61 }
 0x120   : > { %v301_v2 = vpack.c.bf16 %v298_v62, %v298_v62  ;;  %vm272_vm14 = vmor %vm270_vm13, %vm271_vm11 }
 0x121   : > { %v263_v3 = vsel %vm262_vm10, %v396_v49, %v259_v0  ;;  %v266_v4 = vmul.f32 %v398_v61, %v265_v1 }
 0x122   : > { %v309_v5 = vsel %vm307_vm8, %v301_v2, %v308_v63  ;;  %v284_v6 = vmul.f32 %v263_v3, %v233_v30 }
 0x123   : > { %310 = vst [vmem:[%s479_s7 + $0x8] sm:$0x1] %v309_v5  ;;  %v267_v7 = vmul.f32 0.5, %v266_v4 }
 0x124   : > { %v290_v8 = vmul.f32 %v389_v53, %v284_v6 }
 0x125   : > { %v268_v9 = vsub.f32 1.5, %v267_v7 }
 0x126   : > { %v296_v10 = vadd.f32 %v390_v56, %v290_v8 }
 0x127   : > { %v269_v11 = vmul.f32 %v398_v61, %v268_v9 }
 0x128   : > { %v299_v12 = vpack.c.bf16 %v296_v10, %v296_v10 }
 0x129   : > { %v273_v13 = vsel %vm272_vm14, %v398_v61, %v269_v11 }
 0x12a   : > { %303 = vst.msk [vmem:[%s479_s7] sm:$0xf] %vm302_vm12, %v299_v12  ;;  %v285_v14 = vmul.f32 %v273_v13, %v462_v31 }
 0x12c   : > { %v291_v15 = vmul.f32 %v389_v53, %v285_v14 }
 0x12e   : > { %v297_v16 = vadd.f32 %v390_v56, %v291_v15 }
 0x130   : > { %v300_v17 = vpack.c.bf16 %v297_v16, %v297_v16 }
 0x132   : > { %304 = vst.msk [vmem:[%s479_s7 + $0x4] sm:$0xf] %vm302_vm12, %v300_v17 }
 0x133 PF: > { %s14_s15 = sadd.s32 1, %s405_s15  }
 0x134   : > { %p11_p4 = scmp.ge.s32.totalorder %s14_s15, 4  }
 0x136   :  { %13 = sbr.rel (!%p11_p4) target bundleno = 1 (0x1), region = 66 }

// kernel: vision_transformer_forward.5
= control target key start
LH: loop header
LB: loop body
LE: loop exit
PB: predicated region body
PF: predicated region fallthrough
CT: control target
= control target key end

     0   :  { %vm50_vm0 = vcmask 392192   ;;  %vm80_vm1 = vcmask 257024   ;;  %s161_s1 = inlined_call_operand.vmem [shape: bf16[48,32], index: 1, kind: input, shape index: {}]   ;;  %s162_s0 = inlined_call_operand.vmem [shape: bf16[32,48], index: 0, kind: input, shape index: {}]   ;;  %s163_s2 = inlined_call_operand.vmem [shape: bf16[32,32], index: 2, kind: output, shape index: {}]  }
   0x1   :  { %v115_v0 = vld [vmem:[%s161_s1 + $0x10] sm:$0xff]  ;;  %v114_v1 = vld [vmem:[%s161_s1 + $0x8] sm:$0xff]  ;;  %v113_v2 = vld [vmem:[%s161_s1] sm:$0xff] }
   0x2   :  { %62 = vmatpush.bf16.msra.mxu0 %v115_v0  ;;  %116 = vmatpush.bf16.msra.mxu1 %v115_v0  ;;  %v111_v3 = vld [vmem:[%s162_s0] sm:$0xff]  ;;  %v112_v4 = vld [vmem:[%s162_s0 + $0x8] sm:$0xff] }
   0x6   :  { %63 = vmatpush.bf16.msra.mxu0 %v114_v1  ;;  %117 = vmatpush.bf16.msra.mxu1 %v114_v1 }
   0xa   :  { %64 = vmatpush.bf16.msra.mxu0 %v113_v2  ;;  %118 = vmatpush.bf16.msra.mxu1 %v113_v2 }
   0xd   :  { %109 = vmatmul.msk.bf16.vlgmr.msra.gmra.mxu0 %vm50_vm0, %v111_v3  ;;  %110 = vmatmul.msk.bf16.vlgmr.msra.gmra.mxu1 %vm50_vm0, %v112_v4 }
  0x8a   :  { %v66_v5 = vpop.f32.mrf.mxu0  ;;  %v71_v6 = vpop.f32.mrf.mxu1 }
  0x8b   :  { %v76_v7 = vpack.c.bf16 %v66_v5, %v66_v5  ;;  %v78_v8 = vpack.c.bf16 %v71_v6, %v71_v6 }
  0x8d   :  { %81 = vst.msk [vmem:[%s163_s2] sm:$0xf] %vm80_vm1, %v76_v7 }
  0x8e   :  { %83 = vst.msk [vmem:[%s163_s2 + $0x8] sm:$0xf] %vm80_vm1, %v78_v8 }
  0x92   :  { %v68_v9 = vpop.f32.mrf.mxu0  ;;  %v73_v10 = vpop.f32.mrf.mxu1 }
  0x93   :  { %v77_v11 = vpack.c.bf16 %v68_v9, %v68_v9  ;;  %v79_v12 = vpack.c.bf16 %v73_v10, %v73_v10 }
  0x95   :  { %82 = vst.msk [vmem:[%s163_s2 + $0x4] sm:$0xf] %vm80_vm1, %v77_v11 }
  0x96   :  { %84 = vst.msk [vmem:[%s163_s2 + $0xc] sm:$0xf] %vm80_vm1, %v79_v12 }

// kernel: vision_transformer_forward.9
= control target key start
LH: loop header
LB: loop body
LE: loop exit
PB: predicated region body
PF: predicated region fallthrough
CT: control target
= control target key end

     0   :  { %vm23_vm0 = vcmask 254976   ;;  %s205_s0 = inlined_call_operand.vmem [shape: bf16[2,32], index: 0, kind: input, shape index: {}]   ;;  %s206_s1 = inlined_call_operand.vmem [shape: f32[1,32], index: 1, kind: input, shape index: {}]   ;;  %s207_s2 = inlined_call_operand.vmem [shape: f32[1,32], index: 2, kind: input, shape index: {}]   ;;  %s208_s3 = inlined_call_operand.vmem [shape: bf16[32,16], index: 3, kind: input, shape index: {}]   ;;  %s209_s4 = inlined_call_operand.hbm [shape: f32[2,16], index: 4, kind: output, shape index: {}]  }
   0x1   :  { %v19_v0 = vld [vmem:[%s205_s0] sm:$0x1] }
   0x2   :  { %v22_v1 = vunpack.c.l.bf16 %v19_v0 }
   0x3   :  { %9 = vsyncpa [#allocation3], 0  ;;  %v158_v3 = vmov 32.0   ;;  %v123_v15 = vld [vmem:[%s208_s3 + $0x8] sm:$0xff]  ;;  %v122_v16 = vld [vmem:[%s208_s3] sm:$0xff]  ;;  %vm78_vm5 = vcmask 261120  }
   0x4   :  { %v24_v2 = vsel %vm23_vm0, %v22_v1, 0.0  ;;  %128 = vrcp.f32 %v158_v3  ;;  %88 = vmatpush.bf16.msra.mxu0 %v123_v15  ;;  %v126_v26 = vld [vmem:[%s206_s1] ss:$0 sm:$0xff]  ;;  %s159_s23 = smov [#allocation2]   ;;  %s104_s27 = sshll.u32 %s209_s4, 4  ;;  %vm95_vm6 = vcmask 123904   ;;  %s105_s27 = int_to_ptr.hbm [resolvable:$true] %s104_s27 }
   0x5   :  { %25 = vadd.xlane.f32.xlu0 %v24_v2  ;;  %v127_v29 = vld [vmem:[%s207_s2] ss:$0 sm:$0xff]  ;;  %s102_s24 = sshll.u32 %s159_s23, 4  ;;  %s103_s24 = int_to_ptr.vmem [resolvable:$true] %s102_s24 }
   0x8   :  { %89 = vmatpush.bf16.msra.mxu0 %v122_v16 }
   0xa   :  { %v129_v4 = vpop.eup %128 }
   0xb   :  { %v28_v5 = vmul.f32 32.0, %v129_v4  ;;  %vm32_vm1 = vweird.f32 %v129_v4 }
   0xd   :  { %v29_v6 = vsub.f32 1.0, %v28_v5 }
   0xf   :  { %v30_v7 = vmul.f32 %v129_v4, %v29_v6 }
  0x11   :  { %v31_v8 = vadd.f32 %v129_v4, %v30_v7 }
  0x13   :  { %v33_v9 = vsel %vm32_vm1, %v129_v4, %v31_v8 }
  0x78   :  { %v26_v10 = vpop.xlane.xlu0 %25 }
  0x79   :  { %v34_v11 = vmul.f32 %v33_v9, %v26_v10 }
  0x7b   :  { %v35_v12 = vsub.f32 %v22_v1, %v34_v11 }
  0x7d   :  { %v36_v13 = vmul.f32 %v35_v12, %v35_v12 }
  0x7f   :  { %v37_v14 = vsel %vm23_vm0, %v36_v13, 0.0 }
  0x80   :  { %38 = vadd.xlane.f32.xlu0 %v37_v14 }
  0xf3   :  { %v39_v17 = vpop.xlane.xlu0 %38 }
  0xf4   :  { %v40_v18 = vmul.f32 %v39_v17, %v33_v9 }
  0xf6   :  { %v41_v19 = vadd.f32 1e-05, %v40_v18 }
  0xf8   :  { %130 = vrsqrt.f32 %v41_v19  ;;  %vm48_vm3 = vweird.f32 %v41_v19 }
  0xfe   :  { %v131_v20 = vpop.eup %130 }
  0xff   :  { %v43_v21 = vmul.f32 %v131_v20, %v41_v19  ;;  %vm49_vm2 = vweird.f32 %v131_v20 }
 0x100   :  { %vm50_vm4 = vmor %vm48_vm3, %vm49_vm2 }
 0x101   :  { %v44_v22 = vmul.f32 %v131_v20, %v43_v21 }
 0x103   :  { %v45_v23 = vmul.f32 0.5, %v44_v22 }
 0x105   :  { %v46_v24 = vsub.f32 1.5, %v45_v23 }
 0x107   :  { %v47_v25 = vmul.f32 %v131_v20, %v46_v24 }
 0x109   :  { %v51_v27 = vsel %vm50_vm4, %v131_v20, %v47_v25 }
 0x10a   :  { %v52_v28 = vmul.f32 %v51_v27, %v35_v12 }
 0x10c   :  { %v56_v30 = vmul.f32 %v126_v26, %v52_v28 }
 0x10e   :  { %v60_v31 = vadd.f32 %v127_v29, %v56_v30 }
 0x110   :  { %v61_v32 = vpack.c.bf16 %v60_v31, %v60_v31 }
 0x112   :  { %121 = vmatmul.msk.bf16.vlgmr.msra.gmra.mxu0 %vm78_vm5, %v61_v32 }
 0x18f   :  { %v91_v33 = vpop.f32.mrf.mxu0 }
 0x190   :  { %96 = vst.msk [vmem:[#allocation2] sm:$0x3] %vm95_vm6, %v91_v33 }
 0x191   :  { %107 = dma.vmem_to_hbm [thread:$0]  %s103_s24, 32, %s105_s27, [#allocation3]  }
 0x197   :  { %v93_v34 = vpop.f32.mrf.mxu0 }
 0x198   :  { %156 = dma.done.wait [#allocation3], 32  }
 0x199   :  { %157 = vsyncadd [#allocation3], 4294967264 }
 0x19a   :  { %112 = vsyncpa [#allocation3], 1 }

// kernel: vision_transformer_forward.7
= control target key start
LH: loop header
LB: loop body
LE: loop exit
PB: predicated region body
PF: predicated region fallthrough
CT: control target
= control target key end

     0   :  { %s1942_s25 = smov 0   ;;  %s2318_s0 = inlined_call_operand.vmem [shape: bf16[2,17,32], index: 0, kind: input, shape index: {}]   ;;  %s2319_s1 = inlined_call_operand.vmem [shape: f32[1,32], index: 1, kind: input, shape index: {}]   ;;  %s2320_s2 = inlined_call_operand.vmem [shape: f32[1,32], index: 2, kind: input, shape index: {}]   ;;  %s2321_s3 = inlined_call_operand.vmem [shape: bf16[32,96], index: 3, kind: input, shape index: {}]   ;;  %s2322_s4 = inlined_call_operand.vmem [shape: f32[1,96], index: 4, kind: input, shape index: {}]   ;;  %s2323_s5 = inlined_call_operand.vmem [shape: bf16[4,8,32], index: 5, kind: input, shape index: {}]   ;;  %s2324_s6 = inlined_call_operand.vmem [shape: f32[1,32], index: 6, kind: input, shape index: {}]   ;;  %s2325_s7 = inlined_call_operand.vmem [shape: f32[1,32], index: 7, kind: input, shape index: {}]   ;;  %s2326_s8 = inlined_call_operand.vmem [shape: f32[1,32], index: 8, kind: input, shape index: {}]   ;;  %s2327_s9 = inlined_call_operand.vmem [shape: bf16[32,128], index: 9, kind: input, shape index: {}]   ;;  %s2328_s10 = inlined_call_operand.vmem [shape: f32[1,128], index: 10, kind: input, shape index: {}]   ;;  %s2329_s11 = inlined_call_operand.vmem [shape: bf16[128,32], index: 11, kind: input, shape index: {}]   ;;  %s2330_s12 = inlined_call_operand.vmem [shape: f32[1,32], index: 12, kind: input, shape index: {}]   ;;  %s2331_s13 = inlined_call_operand.vmem [shape: bf16[2,17,32], index: 13, kind: output, shape index: {}]  }
   0x1 LB: > { %s1638_s26 = sadd.s32 4294967295, %s1863_s25   ;;  %p1642_p0 = scmp.ge.s32.totalorder %s1863_s25, 1  ;;  %s1863_s25 = sphi %s1942_s25, %s23_s25  }
   0x2   : > { %p387_p1 = scmp.lt.s32.totalorder %s1863_s25, 3 }
   0x4   : > { %p388_p2 = pnand %p1642_p0, %p387_p1 }
   0x5   : > { %p431_p3 = scmp.lt.s32.totalorder (!%p388_p2), %s1638_s26, 1  ;;  %s1866_s24 = smov (!%p388_p2), 120  }
   0x6   : > { %391 = sbr.rel (%p388_p2) target bundleno = 2027 (0x7eb), region = 72  ;;  %s1867_s28 = smov (!%p388_p2), 104  }
   0x7   : > { %s1868_s29 = smov (!%p388_p2), 112   ;;  %s1870_s14 = smov (!%p388_p2), 64  }
   0xb   : > { %s2333_s26 = smov (!%p431_p3, %s1638_s26), 1  ;;  %vm450_vm0 = vcmask 261120   ;;  %vm457_vm1 = vcmask 253952   ;;  %v1865_v8 = vmov 32.0   ;;  %v1727_v30 = vld [vmem:[%s2321_s3 + $0x8] sm:$0xff]  ;;  %v1726_v33 = vld [vmem:[%s2321_s3] sm:$0xff] }
   0xc   : > { %s1744_s27 = smul.u32 12, %s2333_s26  ;;  %1783 = vrcp.f32 %v1865_v8  ;;  %571 = vmatpush.bf16.msra.mxu0 %v1727_v30  ;;  %v1775_v55 = vld [vmem:[%s2319_s1] ss:$0 sm:$0xff]  ;;  %vm637_vm12 = vcmask 64512   ;;  %vm959_vm13 = vcmask 1040384   ;;  %vm794_vm14 = vcmask 138240  }
   0xd   : > { %v1776_v62 = vld [vmem:[%s2320_s2] ss:$0 sm:$0xff]  ;;  %vm801_vm15 = vcmask 131072  }
   0xe   : > { %s435_s30 = scalar_lea.vmem %s2318_s0, %s1744_s27 }
   0xf   : > { %v1739_v0 = vld [vmem:[%s435_s30] sm:$0xff]   ;;  %v444_v1 = vld [vmem:[%s435_s30 + $0x8] sm:$0x1]  ;;  %s1869_s30 = smov 96  }
  0x10   : > { %v1958_v2 = vunpack.c.l.bf16 %v1739_v0  ;;  %v1960_v3 = vunpack.c.l.bf16 %v444_v1  ;;  %v1966_v6 = vunpack.c.h.bf16 %v1739_v0  ;;  %572 = vmatpush.bf16.msra.mxu0 %v1726_v33 }
  0x12   : > { %v451_v4 = vsel %vm450_vm0, %v1958_v2, 0.0  ;;  %v458_v5 = vsel %vm457_vm1, %v1960_v3, 0.0  ;;  %v454_v7 = vsel %vm450_vm0, %v1966_v6, 0.0  ;;  %v1784_v9 = vpop.eup %1783 }
  0x13   : > { %452 = vadd.xlane.f32.xlu0 %v451_v4  ;;  %459 = vadd.xlane.f32.xlu1 %v458_v5  ;;  %v462_v10 = vmul.f32 32.0, %v1784_v9  ;;  %vm466_vm2 = vweird.f32 %v1784_v9 }
  0x15   : > { %v463_v11 = vsub.f32 1.0, %v462_v10 }
  0x17   : > { %v464_v12 = vmul.f32 %v1784_v9, %v463_v11 }
  0x19   : > { %v465_v13 = vadd.f32 %v1784_v9, %v464_v12 }
  0x1b   : > { %455 = vadd.xlane.f32.xlu0 %v454_v7  ;;  %v1970_v14 = vsel %vm466_vm2, %v1784_v9, %v465_v13  ;;  %vm1133_vm2 = vcmask 1043456  }
  0x86   : > { %v453_v15 = vpop.xlane.xlu0 %452  ;;  %v460_v19 = vpop.xlane.xlu1 %459 }
  0x87   : > { %v468_v16 = vmul.f32 %v1970_v14, %v453_v15  ;;  %v470_v23 = vmul.f32 %v1970_v14, %v460_v19 }
  0x89   : > { %v471_v17 = vsub.f32 %v1958_v2, %v468_v16  ;;  %v1979_v25 = vsub.f32 %v1960_v3, %v470_v23  ;;  %v1777_v16 = vld [vmem:[%s2322_s4] ss:$0 sm:$0xff] }
  0x8b   : > { %v474_v18 = vmul.f32 %v471_v17, %v471_v17  ;;  %v476_v28 = vmul.f32 %v1979_v25, %v1979_v25 }
  0x8d   : > { %v477_v20 = vsel %vm450_vm0, %v474_v18, 0.0  ;;  %v483_v29 = vsel %vm457_vm1, %v476_v28, 0.0 }
  0x8e   : > { %478 = vadd.xlane.f32.xlu1 %v477_v20  ;;  %v456_v21 = vpop.xlane.xlu0 %455 }
  0x8f   : > { %v469_v22 = vmul.f32 %v1970_v14, %v456_v21 }
  0x91   : > { %v472_v24 = vsub.f32 %v1966_v6, %v469_v22 }
  0x93   : > { %v475_v26 = vmul.f32 %v472_v24, %v472_v24 }
  0x95   : > { %v480_v27 = vsel %vm450_vm0, %v475_v26, 0.0 }
  0x96   : > { %481 = vadd.xlane.f32.xlu2 %v480_v27 }
  0x9e   : > { %484 = vadd.xlane.f32.xlu2 %v483_v29 }
 0x101   : > { %v479_v31 = vpop.xlane.xlu1 %478 }
 0x102   : > { %v486_v32 = vmul.f32 %v479_v31, %v1970_v14 }
 0x104   : > { %v489_v34 = vadd.f32 1e-05, %v486_v32 }
 0x106   : > { %1785 = vrsqrt.f32 %v489_v34  ;;  %vm498_vm4 = vweird.f32 %v489_v34 }
 0x109   : > { %v482_v35 = vpop.xlane.xlu2 %481 }
 0x10a   : > { %v487_v36 = vmul.f32 %v482_v35, %v1970_v14 }
 0x10c   : > { %v1786_v37 = vpop.eup %1785  ;;  %v490_v38 = vadd.f32 1e-05, %v487_v36 }
 0x10d   : > { %v493_v39 = vmul.f32 %v1786_v37, %v489_v34  ;;  %vm499_vm3 = vweird.f32 %v1786_v37 }
 0x10e   : > { %1787 = vrsqrt.f32 %v490_v38  ;;  %vm500_vm5 = vmor %vm498_vm4, %vm499_vm3  ;;  %vm508_vm7 = vweird.f32 %v490_v38 }
 0x10f   : > { %v494_v40 = vmul.f32 %v1786_v37, %v493_v39 }
 0x111   : > { %v495_v41 = vmul.f32 0.5, %v494_v40  ;;  %v485_v42 = vpop.xlane.xlu2 %484 }
 0x112   : > { %v488_v43 = vmul.f32 %v485_v42, %v1970_v14 }
 0x113   : > { %v496_v44 = vsub.f32 1.5, %v495_v41 }
 0x114   : > { %v1788_v45 = vpop.eup %1787  ;;  %v491_v46 = vadd.f32 1e-05, %v488_v43 }
 0x115   : > { %v497_v47 = vmul.f32 %v1786_v37, %v496_v44  ;;  %v503_v48 = vmul.f32 %v1788_v45, %v490_v38  ;;  %vm509_vm6 = vweird.f32 %v1788_v45 }
 0x116   : > { %1789 = vrsqrt.f32 %v491_v46  ;;  %vm510_vm8 = vmor %vm508_vm7, %vm509_vm6  ;;  %vm518_vm9 = vweird.f32 %v491_v46 }
 0x117   : > { %v504_v49 = vmul.f32 %v1788_v45, %v503_v48  ;;  %v501_v50 = vsel %vm500_vm5, %v1786_v37, %v497_v47 }
 0x118   : > { %v522_v54 = vmul.f32 %v501_v50, %v471_v17 }
 0x119   : > { %v505_v51 = vmul.f32 0.5, %v504_v49 }
 0x11a   : > { %v528_v61 = vmul.f32 %v1775_v55, %v522_v54 }
 0x11b   : > { %v506_v52 = vsub.f32 1.5, %v505_v51 }
 0x11c   : > { %v1790_v53 = vpop.eup %1789  ;;  %v534_v4 = vadd.f32 %v1776_v62, %v528_v61 }
 0x11d   : > { %v507_v56 = vmul.f32 %v1788_v45, %v506_v52  ;;  %v513_v57 = vmul.f32 %v1790_v53, %v491_v46  ;;  %vm519_vm10 = vweird.f32 %v1790_v53 }
 0x11e   : > { %vm520_vm11 = vmor %vm518_vm9, %vm519_vm10 }
 0x11f   : > { %v511_v58 = vsel %vm510_vm8, %v1788_v45, %v507_v56  ;;  %v514_v59 = vmul.f32 %v1790_v53, %v513_v57 }
 0x120   : > { %v523_v60 = vmul.f32 %v511_v58, %v472_v24 }
 0x121   : > { %v515_v63 = vmul.f32 0.5, %v514_v59 }
 0x122   : > { %v529_v0 = vmul.f32 %v1775_v55, %v523_v60 }
 0x123   : > { %v516_v1 = vsub.f32 1.5, %v515_v63 }
 0x124   : > { %v535_v5 = vadd.f32 %v1776_v62, %v529_v0 }
 0x125   : > { %v517_v7 = vmul.f32 %v1790_v53, %v516_v1 }
 0x126   : > { %v537_v8 = vpack.c.bf16 %v535_v5, %v534_v4 }
 0x127   : > { %v521_v9 = vsel %vm520_vm11, %v1790_v53, %v517_v7 }
 0x128   : > { %1653 = vmatmul.msk.bf16.vlgmr.msra.gmra.mxu0 %vm450_vm0, %v537_v8  ;;  %v524_v10 = vmul.f32 %v521_v9, %v1979_v25 }
 0x12a   : > { %v530_v11 = vmul.f32 %v1775_v55, %v524_v10 }
 0x12c   : > { %v536_v12 = vadd.f32 %v1776_v62, %v530_v11 }
 0x12e   : > { %v538_v13 = vpack.c.bf16 %v536_v12, %v536_v12 }
 0x138   : > { %1654 = vmatmul.msk.bf16.gmra.mxu0 %vm450_vm0, %v538_v13 }
 0x1a5   : > { %v574_v15 = vpop.f32.mrf.mxu0 }
 0x1a6   : > { %v575_v19 = vadd.f32 %v1777_v16, %v574_v15 }
 0x1a8   : > { %v613_v24 = vpack.c.bf16 %v575_v19, %v575_v19 }
 0x1aa   : > { %v628_v26 = vunpack.c.l.b16 %v613_v24  ;;  %v1871_v24 = vmov 0  }
 0x1ad   : > { %v576_v17 = vpop.f32.mrf.mxu0 }
 0x1ae   : > { %v577_v18 = vadd.f32 %v1777_v16, %v576_v17 }
 0x1b0   : > { %588 = vrot.lane.b32.xlu2 %v577_v18, %s1866_s24  ;;  %v614_v22 = vpack.c.bf16 %v577_v18, %v577_v18  ;;  %v1770_v29 = vpack.i.bf16 %v577_v18, %v575_v19 }
 0x1b2   : > { %v629_v25 = vunpack.c.l.b16 %v614_v22 }
 0x1b4   : > { %v2006_v28 = vpack.c.b16 %v629_v25, %v628_v26  ;;  %v2051_v25 = vsel %vm959_vm13, 65535, %v1871_v24 }
 0x1b5   : > { %v579_v20 = vpop.f32.mrf.mxu0 }
 0x1b6   : > { %v580_v21 = vadd.f32 %v1777_v16, %v579_v20 }
 0x1b8   : > { %608 = vrot.lane.b32.xlu2 %v580_v21, %s1867_s28  ;;  %599 = vrot.lane.b32.xlu1 %v580_v21, %s1868_s29  ;;  %v1760_v23 = vpack.i.bf16 %v575_v19, %v580_v21  ;;  %v615_v30 = vpack.c.bf16 %v580_v21, %v580_v21 }
 0x1ba   : > { %1761 = vrot.lane.b32.xlu0 %v1760_v23, %s1866_s24  ;;  %v630_v31 = vunpack.c.l.b16 %v615_v30 }
 0x1bc   : > { %v2010_v32 = vpack.c.b16 %v630_v31, %v630_v31 }
 0x1bd   : > { %v581_v27 = vpop.f32.mrf.mxu0 }
 0x1c0   : > { %633 = vrot.lane.b32.xlu2 %v2006_v28, %s1869_s30  ;;  %1771 = vrot.lane.b32.xlu1 %v1770_v29, %s1867_s28 }
 0x1c2   : > { %1766 = vrot.lane.b32.xlu0 %v1770_v29, %s1868_s29 }
 0x1ca   : > { %635 = vrot.lane.b32.xlu0 %v2010_v32, %s1869_s30 }
 0x20a   : > { %v589_v33 = vpop.permute.xlu2 %588 }
 0x20b   : > { %v617_v38 = vpack.c.bf16 %v589_v33, %v589_v33 }
 0x20d   : > { %v672_v46 = vunpack.c.l.b16 %v617_v38 }
 0x212   : > { %v609_v35 = vpop.permute.xlu2 %608 }
 0x213   : > { %v624_v42 = vpack.c.bf16 %v609_v35, %v609_v35 }
 0x215   : > { %v757_v49 = vunpack.c.l.b16 %v624_v42 }
 0x217   : > { %v2026_v60 = vpack.c.b16 %v757_v49, %v757_v49 }
 0x21a   : > { %v634_v10 = vpop.permute.xlu2 %633 }
 0x21b   : > { %v645_v11 = vsel %vm637_vm12, %v634_v10, 0 }
 0x22a   : > { %v600_v34 = vpop.permute.xlu1 %599 }
 0x22b   : > { %v621_v36 = vpack.c.bf16 %v600_v34, %v600_v34 }
 0x22c   : > { %v1762_v37 = vpop.permute.xlu0 %1761 }
 0x22d   : > { %v715_v39 = vunpack.c.l.b16 %v621_v36  ;;  %v1764_v40 = vunpack.i.h.bf16 %v1762_v37  ;;  %v1763_v41 = vunpack.i.l.bf16 %v1762_v37 }
 0x22f   : > { %v2014_v43 = vpack.c.b16 %v715_v39, %v715_v39  ;;  %v616_v44 = vpack.c.bf16 %v1764_v40, %v1764_v40  ;;  %v618_v45 = vpack.c.bf16 %v1763_v41, %v1763_v41 }
 0x231   : > { %v671_v47 = vunpack.c.l.b16 %v616_v44  ;;  %v673_v48 = vunpack.c.l.b16 %v618_v45  ;;  %720 = vrot.lane.b32.xlu0 %v2014_v43, %s1869_s30 }
 0x232   : > { %v1772_v50 = vpop.permute.xlu1 %1771 }
 0x233   : > { %v2018_v51 = vpack.c.b16 %v673_v48, %v673_v48  ;;  %v1774_v52 = vunpack.i.h.bf16 %v1772_v50  ;;  %v1773_v53 = vunpack.i.l.bf16 %v1772_v50  ;;  %v2020_v54 = vpack.c.b16 %v672_v46, %v671_v47 }
 0x234   : > { %v1767_v55 = vpop.permute.xlu0 %1766 }
 0x235   : > { %v623_v56 = vpack.c.bf16 %v1774_v52, %v1774_v52  ;;  %v622_v57 = vpack.c.bf16 %v1773_v53, %v1773_v53  ;;  %v1769_v58 = vunpack.i.h.bf16 %v1767_v55  ;;  %v1768_v59 = vunpack.i.l.bf16 %v1767_v55  ;;  %678 = vrot.lane.b32.xlu1 %v2018_v51, %s1869_s30  ;;  %676 = vrot.lane.b32.xlu2 %v2020_v54, %s1869_s30 }
 0x237   : > { %v756_v61 = vunpack.c.l.b16 %v623_v56  ;;  %v755_v62 = vunpack.c.l.b16 %v622_v57  ;;  %v620_v63 = vpack.c.bf16 %v1769_v58, %v1769_v58  ;;  %v619_v0 = vpack.c.bf16 %v1768_v59, %v1768_v59 }
 0x239   : > { %v714_v1 = vunpack.c.l.b16 %v620_v63  ;;  %v713_v4 = vunpack.c.l.b16 %v619_v0  ;;  %762 = vrot.lane.b32.xlu0 %v2026_v60, %s1869_s30  ;;  %v2032_v7 = vpack.c.b16 %v756_v61, %v755_v62 }
 0x23b   : > { %v2030_v5 = vpack.c.b16 %v714_v1, %v713_v4 }
 0x23c   : > { %v636_v8 = vpop.permute.xlu0 %635 }
 0x23d   : > { %718 = vrot.lane.b32.xlu1 %v2030_v5, %s1869_s30  ;;  %760 = vrot.lane.b32.xlu2 %v2032_v7, %s1869_s30  ;;  %v648_v9 = vsel %vm637_vm12, %v636_v8, 0  ;;  %s440_s30 = scalar_lea.vmem %s2331_s13, %s1744_s27 }
 0x23e   : > { %656 = vmatpush.bf16.xpose.msra.mxu1 %v648_v9  ;;  %1742 = vmatpush.bf16.xpose.msra.mxu3 %v648_v9 }
 0x241   : > { %993 = vrot.lane.b32.xlu0 %v2018_v51, %s1870_s14 }
 0x246   : > { %657 = vmatpush.bf16.xpose.msra.mxu1 %v645_v11  ;;  %1743 = vmatpush.bf16.xpose.msra.mxu3 %v645_v11 }
 0x24d   : > { %1655 = vmatmul.msk.bf16.vlgmr.msra.gmra.mxu1 %vm637_vm12, %v2006_v28  ;;  %1656 = vmatmul.msk.bf16.vlgmr.msra.gmra.mxu3 %vm637_vm12, %v2010_v32 }
 0x28f   : > { %v677_v15 = vpop.permute.xlu2 %676 }
 0x290   : > { %v687_v21 = vsel %vm637_vm12, %v677_v15, 0 }
 0x297   : > { %v761_v23 = vpop.permute.xlu2 %760 }
 0x298   : > { %v771_v29 = vsel %vm637_vm12, %v761_v23, 0 }
 0x2a3   : > { %v721_v12 = vpop.permute.xlu0 %720 }
 0x2a4   : > { %v732_v13 = vsel %vm637_vm12, %v721_v12, 0 }
 0x2a5   : > { %740 = vmatpush.bf16.xpose.msrb.mxu3 %v732_v13 }
 0x2a7   : > { %v679_v16 = vpop.permute.xlu1 %678 }
 0x2a8   : > { %v690_v17 = vsel %vm637_vm12, %v679_v16, 0 }
 0x2a9   : > { %698 = vmatpush.bf16.xpose.msra.mxu2 %v690_v17 }
 0x2ab   : > { %v763_v18 = vpop.permute.xlu0 %762 }
 0x2ac   : > { %v774_v19 = vsel %vm637_vm12, %v763_v18, 0 }
 0x2ad   : > { %782 = vmatpush.bf16.xpose.msrb.mxu0 %v774_v19 }
 0x2af   : > { %v719_v20 = vpop.permute.xlu1 %718 }
 0x2b0   : > { %v729_v22 = vsel %vm637_vm12, %v719_v20, 0 }
 0x2b1   : > { %699 = vmatpush.bf16.xpose.msra.mxu2 %v687_v21  ;;  %741 = vmatpush.bf16.xpose.msrb.mxu3 %v729_v22 }
 0x2b3   : > { %v994_v26 = vpop.permute.xlu0 %993 }
 0x2b4   : > { %v1003_v27 = vand.u32 %v994_v26, %v2051_v25 }
 0x2b5   : > { %783 = vmatpush.bf16.xpose.msrb.mxu0 %v771_v29 }
 0x2b8   : > { %1657 = vmatmul.msk.bf16.vlgmr.msra.gmra.mxu2 %vm637_vm12, %v2020_v54  ;;  %1659 = vmatmul.msk.bf16.vlgmr.msrb.gmra.mxu3 %vm637_vm12, %v2030_v5 }
 0x2b9   : > { %1011 = vmatpush.bf16.msrb.mxu2 %v1003_v27 }
 0x2bc   : > { %1661 = vmatmul.msk.bf16.vlgmr.msrb.gmra.mxu0 %vm637_vm12, %v2032_v7 }
 0x2c8   : > { %1658 = vmatmul.msk.bf16.gmra.mxu2 %vm637_vm12, %v2018_v51  ;;  %1660 = vmatmul.msk.bf16.gmra.mxu3 %vm637_vm12, %v2014_v43 }
 0x2ca   : > { %v659_v30 = vpop.f32.mrf.mxu1 }
 0x2cb   : > { %v795_v31 = vsel %vm794_vm14, %v659_v30, -inf }
 0x2cc   : > { %796 = vmax.xlane.f32.xlu0 %v795_v31  ;;  %1662 = vmatmul.msk.bf16.gmra.mxu0 %vm637_vm12, %v2026_v60 }
 0x2d0   : > { %v2068_v33 = vpop.f32.mrf.mxu3 }
 0x2d1   : > { %v802_v35 = vsel %vm801_vm15, %v2068_v33, -inf }
 0x2d2   : > { %v661_v34 = vpop.f32.mrf.mxu1 }
 0x2d3   : > { %v798_v36 = vsel %vm794_vm14, %v661_v34, -inf }
 0x2d4   : > { %803 = vmax.xlane.f32.xlu0 %v802_v35  ;;  %799 = vmax.xlane.f32.xlu2 %v798_v36 }
 0x2d8   : > { %v666_v37 = vpop.f32.mrf.mxu3 }
 0x339   : > { %v2073_v38 = vpop.f32.mrf.mxu0 }
 0x33a   : > { %v823_v39 = vsel %vm794_vm14, %v2073_v38, -inf }
 0x33b   : > { %v701_v40 = vpop.f32.mrf.mxu2  ;;  %v743_v41 = vpop.f32.mrf.mxu3  ;;  %824 = vmax.xlane.f32.xlu1 %v823_v39 }
 0x33c   : > { %v814_v42 = vsel %vm794_vm14, %v743_v41, -inf  ;;  %v805_v48 = vsel %vm794_vm14, %v701_v40, -inf }
 0x33d   : > { %815 = vmax.xlane.f32.xlu2 %v814_v42 }
 0x33f   : > { %v797_v44 = vpop.xlane.xlu0 %796 }
 0x340   : > { %v832_v45 = vsub.f32 %v659_v30, %v797_v44 }
 0x341   : > { %v2078_v46 = vpop.f32.mrf.mxu0 }
 0x342   : > { %v844_v47 = vmul.f32 1.442695, %v832_v45  ;;  %v826_v49 = vsel %vm794_vm14, %v2078_v46, -inf }
 0x343   : > { %v703_v50 = vpop.f32.mrf.mxu2  ;;  %v2083_v51 = vpop.f32.mrf.mxu3  ;;  %806 = vmax.xlane.f32.xlu1 %v805_v48  ;;  %827 = vmax.xlane.f32.xlu0 %v826_v49 }
 0x344   : > { %1791 = vpow2.f32 %v844_v47  ;;  %v808_v55 = vsel %vm794_vm14, %v703_v50, -inf  ;;  %v817_v1 = vsel %vm794_vm14, %v2083_v51, -inf }
 0x347   : > { %v800_v59 = vpop.xlane.xlu2 %799 }
 0x348   : > { %v833_v62 = vsub.f32 %v661_v34, %v800_v59 }
 0x349   : > { %v2085_v52 = vpop.f32.mrf.mxu0 }
 0x34a   : > { %v2087_v53 = vpop.eup %1791  ;;  %v846_v4 = vmul.f32 1.442695, %v833_v62  ;;  %v829_v8 = vsel %vm801_vm15, %v2085_v52, -inf }
 0x34b   : > { %v2090_v56 = vpop.f32.mrf.mxu2  ;;  %v2092_v57 = vpop.f32.mrf.mxu3  ;;  %809 = vmax.xlane.f32.xlu0 %v808_v55  ;;  %v868_v58 = vsel %vm794_vm14, %v2087_v53, 0.0 }
 0x34c   : > { %869 = vadd.xlane.f32.xlu1 %v868_v58  ;;  %1793 = vpow2.f32 %v846_v4  ;;  %v820_v11 = vsel %vm801_vm15, %v2092_v57, -inf  ;;  %v811_v12 = vsel %vm801_vm15, %v2090_v56, -inf }
 0x351   : > { %v792_v61 = vpop.f32.mrf.mxu0 }
 0x352   : > { %v1794_v9 = vpop.eup %1793 }
 0x353   : > { %v708_v63 = vpop.f32.mrf.mxu2  ;;  %v750_v0 = vpop.f32.mrf.mxu3  ;;  %v871_v10 = vsel %vm794_vm14, %v1794_v9, 0.0 }
 0x354   : > { %818 = vmax.xlane.f32.xlu1 %v817_v1 }
 0x355   : > { %1033 = vrot.lane.b32.xlu2 %v2014_v43, %s1870_s14  ;;  %v2113_v43 = vpop.xlane.xlu0 %803 }
 0x35c   : > { %830 = vmax.xlane.f32.xlu1 %v829_v8 }
 0x364   : > { %872 = vadd.xlane.f32.xlu1 %v871_v10 }
 0x36c   : > { %821 = vmax.xlane.f32.xlu1 %v820_v11 }
 0x37e   : > { %812 = vmax.xlane.f32.xlu2 %v811_v12 }
 0x385   : > { %1031 = vrot.lane.b32.xlu1 %v2030_v5, %s1870_s14 }
 0x38d   : > { %950 = vrot.lane.b32.xlu1 %v2010_v32, %s1870_s14 }
 0x395   : > { %1073 = vrot.lane.b32.xlu1 %v2026_v60, %s1870_s14 }
 0x3ae   : > { %v825_v13 = vpop.xlane.xlu1 %824 }
 0x3af   : > { %v841_v22 = vsub.f32 %v2073_v38, %v825_v13 }
 0x3b0   : > { %v816_v15 = vpop.xlane.xlu2 %815 }
 0x3b1   : > { %v838_v16 = vsub.f32 %v743_v41, %v816_v15  ;;  %v862_v24 = vmul.f32 1.442695, %v841_v22 }
 0x3b3   : > { %v856_v17 = vmul.f32 1.442695, %v838_v16 }
 0x3b5   : > { %1795 = vpow2.f32 %v856_v17 }
 0x3b6   : > { %v807_v18 = vpop.xlane.xlu1 %806  ;;  %v828_v19 = vpop.xlane.xlu0 %827 }
 0x3b7   : > { %v835_v20 = vsub.f32 %v701_v40, %v807_v18  ;;  %v842_v62 = vsub.f32 %v2078_v46, %v828_v19 }
 0x3b8   : > { %v1034_v21 = vpop.permute.xlu2 %1033 }
 0x3b9   : > { %v850_v5 = vmul.f32 1.442695, %v835_v20  ;;  %v1043_v23 = vand.u32 %v1034_v21, %v2051_v25 }
 0x3bb   : > { %v2117_v32 = vpop.eup %1795  ;;  %1797 = vpow2.f32 %v850_v5  ;;  %1051 = vmatpush.bf16.msra.mxu3 %v1043_v23 }
 0x3bc   : > { %v886_v60 = vsel %vm794_vm14, %v2117_v32, 0.0  ;;  %1799 = vpow2.f32 %v862_v24 }
 0x3bd   : > { %887 = vadd.xlane.f32.xlu0 %v886_v60 }
 0x3be   : > { %v810_v26 = vpop.xlane.xlu0 %809 }
 0x3bf   : > { %v836_v27 = vsub.f32 %v703_v50, %v810_v26  ;;  %v870_v29 = vpop.xlane.xlu1 %869 }
 0x3c1   : > { %v2121_v30 = vpop.eup %1797  ;;  %v852_v31 = vmul.f32 1.442695, %v836_v27 }
 0x3c2   : > { %v877_v34 = vsel %vm794_vm14, %v2121_v30, 0.0  ;;  %v2125_v35 = vpop.eup %1799 }
 0x3c3   : > { %1801 = vpow2.f32 %v852_v31  ;;  %878 = vadd.xlane.f32.xlu2 %v877_v34  ;;  %v895_v40 = vsel %vm794_vm14, %v2125_v35, 0.0 }
 0x3c7   : > { %v819_v36 = vpop.xlane.xlu1 %818 }
 0x3c8   : > { %v839_v37 = vsub.f32 %v2083_v51, %v819_v36 }
 0x3c9   : > { %v2128_v38 = vpop.eup %1801 }
 0x3ca   : > { %v858_v39 = vmul.f32 1.442695, %v839_v37  ;;  %v880_v41 = vsel %vm794_vm14, %v2128_v38, 0.0 }
 0x3cb   : > { %896 = vadd.xlane.f32.xlu2 %v895_v40  ;;  %881 = vadd.xlane.f32.xlu1 %v880_v41 }
 0x3cc   : > { %1803 = vpow2.f32 %v858_v39 }
 0x3cd   : > { %1805 = vrcp.f32 %v870_v29 }
 0x3cf   : > { %v831_v42 = vpop.xlane.xlu1 %830 }
 0x3d0   : > { %v843_v15 = vsub.f32 %v2085_v52, %v831_v42 }
 0x3d1   : > { %991 = vrot.lane.b32.xlu0 %v2020_v54, %s1870_s14 }
 0x3d2   : > { %v2136_v44 = vpop.eup %1803 }
 0x3d3   : > { %v889_v45 = vsel %vm794_vm14, %v2136_v44, 0.0  ;;  %v1806_v48 = vpop.eup %1805 }
 0x3d4   : > { %890 = vadd.xlane.f32.xlu2 %v889_v45  ;;  %v916_v49 = vmul.f32 %v1806_v48, %v2087_v53  ;;  %v864_v53 = vmul.f32 1.442695, %v842_v62 }
 0x3d6   : > { %v928_v51 = vpack.c.bf16 %v916_v49, %v916_v49 }
 0x3d7   : > { %v873_v47 = vpop.xlane.xlu1 %872 }
 0x3d8   : > { %1807 = vrcp.f32 %v873_v47  ;;  %v2141_v59 = vunpack.c.l.b16 %v928_v51 }
 0x3d9   : > { %1809 = vpow2.f32 %v864_v53 }
 0x3de   : > { %v1808_v50 = vpop.eup %1807 }
 0x3df   : > { %v917_v55 = vmul.f32 %v1808_v50, %v1794_v9  ;;  %v822_v63 = vpop.xlane.xlu1 %821  ;;  %v2153_v8 = vpop.eup %1809 }
 0x3e0   : > { %v898_v46 = vsel %vm794_vm14, %v2153_v8, 0.0 }
 0x3e1   : > { %v929_v58 = vpack.c.bf16 %v917_v55, %v917_v55 }
 0x3e3   : > { %v2143_v61 = vunpack.c.l.b16 %v929_v58 }
 0x3e4   : > { %948 = vrot.lane.b32.xlu1 %v2006_v28, %s1870_s14  ;;  %v834_v28 = vsub.f32 %v2068_v33, %v2113_v43  ;;  %v866_v43 = vmul.f32 1.442695, %v843_v15 }
 0x3e5   : > { %v946_v54 = vpack.c.b16 %v2143_v61, %v2141_v59 }
 0x3e6   : > { %v848_v10 = vmul.f32 1.442695, %v834_v28 }
 0x3ec   : > { %1071 = vrot.lane.b32.xlu2 %v2032_v7, %s1870_s14  ;;  %v840_v7 = vsub.f32 %v2092_v57, %v822_v63 }
 0x3f1   : > { %v813_v0 = vpop.xlane.xlu2 %812 }
 0x3f2   : > { %v837_v1 = vsub.f32 %v2090_v56, %v813_v0  ;;  %v860_v56 = vmul.f32 1.442695, %v840_v7 }
 0x3f4   : > { %v854_v4 = vmul.f32 1.442695, %v837_v1 }
 0x3f6   : > { %1811 = vpow2.f32 %v854_v4 }
 0x3f7   : > { %v1032_v9 = vpop.permute.xlu1 %1031  ;;  %1813 = vpow2.f32 %v848_v10 }
 0x3f8   : > { %1052 = vmatpush.bf16.msra.mxu3 %v1032_v9  ;;  %1815 = vpow2.f32 %v860_v56 }
 0x3f9   : > { %1817 = vpow2.f32 %v866_v43 }
 0x3fb   : > { %899 = vadd.xlane.f32.xlu0 %v898_v46 }
 0x3fc   : > { %v2160_v11 = vpop.eup %1811 }
 0x3fd   : > { %v883_v33 = vsel %vm801_vm15, %v2160_v11, 0.0  ;;  %v2166_v16 = vpop.eup %1813 }
 0x3fe   : > { %v2169_v18 = vpop.eup %1815  ;;  %v874_v19 = vsel %vm801_vm15, %v2166_v16, 0.0 }
 0x3ff   : > { %v951_v12 = vpop.permute.xlu1 %950  ;;  %v892_v52 = vsel %vm801_vm15, %v2169_v18, 0.0  ;;  %v2175_v20 = vpop.eup %1817 }
 0x400   : > { %v963_v13 = vand.u32 %v2051_v25, %v951_v12  ;;  %v901_v21 = vsel %vm801_vm15, %v2175_v20, 0.0 }
 0x402   : > { %971 = vmatpush.bf16.msrb.mxu1 %v963_v13 }
 0x403   : > { %884 = vadd.xlane.f32.xlu0 %v883_v33 }
 0x407   : > { %v1074_v57 = vpop.permute.xlu1 %1073 }
 0x408   : > { %v1083_v17 = vand.u32 %v1074_v57, %v2051_v25 }
 0x40a   : > { %1091 = vmatpush.bf16.msra.mxu0 %v1083_v17 }
 0x40b   : > { %875 = vadd.xlane.f32.xlu0 %v874_v19 }
 0x40e   : > { %893 = vadd.xlane.f32.xlu1 %v892_v52 }
 0x413   : > { %902 = vadd.xlane.f32.xlu0 %v901_v21 }
 0x430   : > { %v888_v25 = vpop.xlane.xlu0 %887 }
 0x436   : > { %v879_v22 = vpop.xlane.xlu2 %878 }
 0x437   : > { %1819 = vrcp.f32 %v879_v22 }
 0x43d   : > { %v1820_v60 = vpop.eup %1819 }
 0x43e   : > { %v882_v5 = vpop.xlane.xlu1 %881  ;;  %v897_v23 = vpop.xlane.xlu2 %896  ;;  %v919_v24 = vmul.f32 %v1820_v60, %v2121_v30  ;;  %v1117_v60 = vld [vmem:[%s2323_s5 + $0x8] sm:$0xf] }
 0x43f   : > { %1821 = vrcp.f32 %v882_v5 }
 0x440   : > { %1823 = vrcp.f32 %v888_v25  ;;  %v931_v29 = vpack.c.bf16 %v919_v24, %v919_v24  ;;  %v1205_v24 = vsel %vm1133_vm2, %v1117_v60, 0 }
 0x441   : > { %1214 = vmatpush.bf16.msrb.mxu3 %v1205_v24 }
 0x442   : > { %v986_v39 = vunpack.c.l.b16 %v931_v29 }
 0x443   : > { %v992_v26 = vpop.permute.xlu0 %991 }
 0x444   : > { %1012 = vmatpush.bf16.msrb.mxu2 %v992_v26  ;;  %v1118_v26 = vld [vmem:[%s2323_s5 + $0xc] sm:$0xf] }
 0x445   : > { %v1822_v27 = vpop.eup %1821 }
 0x446   : > { %v920_v31 = vmul.f32 %v1822_v27, %v2128_v38  ;;  %v1824_v36 = vpop.eup %1823  ;;  %v1240_v27 = vsel %vm1133_vm2, %v1118_v26, 0 }
 0x447   : > { %v891_v34 = vpop.xlane.xlu2 %890  ;;  %v922_v41 = vmul.f32 %v1824_v36, %v2117_v32 }
 0x448   : > { %v932_v37 = vpack.c.bf16 %v920_v31, %v920_v31  ;;  %1825 = vrcp.f32 %v891_v34 }
 0x449   : > { %v934_v47 = vpack.c.bf16 %v922_v41, %v922_v41  ;;  %1827 = vrcp.f32 %v897_v23  ;;  %v1115_v23 = vld [vmem:[%s2323_s5] sm:$0xf] }
 0x44a   : > { %v987_v40 = vunpack.c.l.b16 %v932_v37 }
 0x44b   : > { %v1026_v50 = vunpack.c.l.b16 %v934_v47 }
 0x44c   : > { %v989_v42 = vpack.c.b16 %v987_v40, %v986_v39 }
 0x44e   : > { %v1826_v45 = vpop.eup %1825  ;;  %1665 = vmatmul.msk.bf16.vlgmr.msrb.gmra.mxu2 %vm794_vm14, %v989_v42 }
 0x44f   : > { %v923_v30 = vmul.f32 %v1826_v45, %v2136_v44  ;;  %v1072_v48 = vpop.permute.xlu2 %1071  ;;  %v1828_v58 = vpop.eup %1827 }
 0x450   : > { %1092 = vmatpush.bf16.msra.mxu0 %v1072_v48  ;;  %v925_v44 = vmul.f32 %v1828_v58, %v2125_v35 }
 0x451   : > { %v935_v49 = vpack.c.bf16 %v923_v30, %v923_v30 }
 0x452   : > { %v937_v53 = vpack.c.bf16 %v925_v44, %v925_v44 }
 0x453   : > { %v1027_v38 = vunpack.c.l.b16 %v935_v49 }
 0x454   : > { %v1066_v4 = vunpack.c.l.b16 %v937_v53  ;;  %1249 = vmatpush.bf16.msrb.mxu0 %v1240_v27 }
 0x455   : > { %v1029_v51 = vpack.c.b16 %v1027_v38, %v1026_v50 }
 0x456   : > { %v949_v55 = vpop.permute.xlu1 %948 }
 0x457   : > { %972 = vmatpush.bf16.msrb.mxu1 %v949_v55  ;;  %1667 = vmatmul.msk.bf16.vlgmr.msra.gmra.mxu3 %vm794_vm14, %v1029_v51 }
 0x45a   : > { %1663 = vmatmul.msk.bf16.vlgmr.msrb.gmra.mxu1 %vm794_vm14, %v946_v54 }
 0x46e   : > { %v900_v32 = vpop.xlane.xlu0 %899 }
 0x46f   : > { %1829 = vrcp.f32 %v900_v32 }
 0x475   : > { %v1830_v62 = vpop.eup %1829 }
 0x476   : > { %v926_v63 = vmul.f32 %v1830_v62, %v2153_v8  ;;  %v885_v0 = vpop.xlane.xlu0 %884 }
 0x477   : > { %1831 = vrcp.f32 %v885_v0 }
 0x478   : > { %v938_v1 = vpack.c.bf16 %v926_v63, %v926_v63 }
 0x47a   : > { %v1067_v9 = vunpack.c.l.b16 %v938_v1 }
 0x47c   : > { %v1069_v28 = vpack.c.b16 %v1067_v9, %v1066_v4 }
 0x47d   : > { %v1832_v46 = vpop.eup %1831 }
 0x47e   : > { %v876_v59 = vpop.xlane.xlu0 %875  ;;  %1669 = vmatmul.msk.bf16.vlgmr.msra.gmra.mxu0 %vm794_vm14, %v1069_v28  ;;  %v921_v61 = vmul.f32 %v1832_v46, %v2160_v11 }
 0x47f   : > { %1833 = vrcp.f32 %v876_v59 }
 0x480   : > { %v933_v54 = vpack.c.bf16 %v921_v61, %v921_v61 }
 0x481   : > { %v894_v7 = vpop.xlane.xlu1 %893 }
 0x482   : > { %1835 = vrcp.f32 %v894_v7  ;;  %v988_v35 = vunpack.c.l.b16 %v933_v54 }
 0x484   : > { %v990_v10 = vpack.c.b16 %v988_v35, %v988_v35 }
 0x485   : > { %v1834_v12 = vpop.eup %1833 }
 0x486   : > { %v903_v8 = vpop.xlane.xlu0 %902  ;;  %1666 = vmatmul.msk.bf16.gmra.mxu2 %vm794_vm14, %v990_v10  ;;  %v918_v56 = vmul.f32 %v1834_v12, %v2166_v16 }
 0x487   : > { %1837 = vrcp.f32 %v903_v8 }
 0x488   : > { %v1836_v13 = vpop.eup %1835  ;;  %v930_v15 = vpack.c.bf16 %v918_v56, %v918_v56 }
 0x489   : > { %v924_v33 = vmul.f32 %v1836_v13, %v2169_v18  ;;  %v1116_v18 = vld [vmem:[%s2323_s5 + $0x4] sm:$0xf] }
 0x48a   : > { %v945_v43 = vunpack.c.l.b16 %v930_v15  ;;  %v1170_v5 = vsel %vm1133_vm2, %v1116_v18, 0 }
 0x48b   : > { %v936_v57 = vpack.c.bf16 %v924_v33, %v924_v33  ;;  %1179 = vmatpush.bf16.msra.mxu2 %v1170_v5 }
 0x48c   : > { %v947_v11 = vpack.c.b16 %v945_v43, %v945_v43 }
 0x48d   : > { %v1838_v17 = vpop.eup %1837  ;;  %v1028_v19 = vunpack.c.l.b16 %v936_v57 }
 0x48e   : > { %1664 = vmatmul.msk.bf16.gmra.mxu1 %vm794_vm14, %v947_v11  ;;  %v927_v52 = vmul.f32 %v1838_v17, %v2175_v20  ;;  %v1135_v20 = vsel %vm1133_vm2, %v1115_v23, 0 }
 0x48f   : > { %v1030_v21 = vpack.c.b16 %v1028_v19, %v1028_v19  ;;  %1144 = vmatpush.bf16.msra.mxu1 %v1135_v20 }
 0x490   : > { %v939_v22 = vpack.c.bf16 %v927_v52, %v927_v52 }
 0x491   : > { %1668 = vmatmul.msk.bf16.gmra.mxu3 %vm794_vm14, %v1030_v21 }
 0x492   : > { %v1068_v25 = vunpack.c.l.b16 %v939_v22 }
 0x494   : > { %v1070_v16 = vpack.c.b16 %v1068_v25, %v1068_v25 }
 0x496   : > { %1670 = vmatmul.msk.bf16.gmra.mxu0 %vm794_vm14, %v1070_v16 }
 0x4d1   : > { %v1014_v29 = vpop.f32.mrf.mxu2 }
 0x4d2   : > { %v1106_v34 = vpack.c.bf16 %v1014_v29, %v1014_v29 }
 0x4d4   : > { %v1158_v40 = vunpack.c.l.b16 %v1106_v34  ;;  %v1778_v34 = vld [vmem:[%s2324_s6] ss:$0 sm:$0xff] }
 0x4d7   : > { %v974_v31 = vpop.f32.mrf.mxu1 }
 0x4d8   : > { %v1103_v42 = vpack.c.bf16 %v974_v31, %v974_v31 }
 0x4d9   : > { %v1016_v36 = vpop.f32.mrf.mxu2 }
 0x4da   : > { %v1107_v37 = vpack.c.bf16 %v1016_v36, %v1016_v36  ;;  %v1054_v39 = vpop.f32.mrf.mxu3  ;;  %v1122_v49 = vunpack.c.l.b16 %v1103_v42 }
 0x4db   : > { %v1109_v48 = vpack.c.bf16 %v1054_v39, %v1054_v39 }
 0x4dc   : > { %v1159_v41 = vunpack.c.l.b16 %v1107_v37 }
 0x4dd   : > { %v1193_v32 = vunpack.c.l.b16 %v1109_v48 }
 0x4de   : > { %v1161_v45 = vpack.c.b16 %v1159_v41, %v1158_v40 }
 0x4df   : > { %v976_v47 = vpop.f32.mrf.mxu1 }
 0x4e0   : > { %v1104_v30 = vpack.c.bf16 %v976_v47, %v976_v47  ;;  %1673 = vmatmul.msk.bf16.vlgmr.msra.gmra.mxu2 %vm637_vm12, %v1161_v45 }
 0x4e2   : > { %v1123_v50 = vunpack.c.l.b16 %v1104_v30  ;;  %v1056_v38 = vpop.f32.mrf.mxu3 }
 0x4e3   : > { %v1110_v51 = vpack.c.bf16 %v1056_v38, %v1056_v38 }
 0x4e4   : > { %v1125_v55 = vpack.c.b16 %v1123_v50, %v1122_v49 }
 0x4e5   : > { %v1194_v58 = vunpack.c.l.b16 %v1110_v51 }
 0x4e6   : > { %1671 = vmatmul.msk.bf16.vlgmr.msra.gmra.mxu1 %vm637_vm12, %v1125_v55 }
 0x4e7   : > { %v1196_v44 = vpack.c.b16 %v1194_v58, %v1193_v32 }
 0x4e9   : > { %1675 = vmatmul.msk.bf16.vlgmr.msrb.gmra.mxu3 %vm637_vm12, %v1196_v44 }
 0x4fb   : > { %v1094_v62 = vpop.f32.mrf.mxu0 }
 0x4fc   : > { %v1112_v53 = vpack.c.bf16 %v1094_v62, %v1094_v62 }
 0x4fe   : > { %v1228_v1 = vunpack.c.l.b16 %v1112_v53 }
 0x503   : > { %v1096_v63 = vpop.f32.mrf.mxu0 }
 0x504   : > { %v1113_v0 = vpack.c.bf16 %v1096_v63, %v1096_v63 }
 0x506   : > { %v1229_v4 = vunpack.c.l.b16 %v1113_v0 }
 0x508   : > { %v1231_v9 = vpack.c.b16 %v1229_v4, %v1228_v1 }
 0x509   : > { %v1019_v28 = vpop.f32.mrf.mxu2 }
 0x50a   : > { %v1108_v46 = vpack.c.bf16 %v1019_v28, %v1019_v28  ;;  %1677 = vmatmul.msk.bf16.vlgmr.msrb.gmra.mxu0 %vm637_vm12, %v1231_v9 }
 0x50b   : > { %v979_v59 = vpop.f32.mrf.mxu1 }
 0x50c   : > { %v1160_v61 = vunpack.c.l.b16 %v1108_v46  ;;  %v1105_v54 = vpack.c.bf16 %v979_v59, %v979_v59 }
 0x50e   : > { %v1162_v7 = vpack.c.b16 %v1160_v61, %v1160_v61  ;;  %v1124_v35 = vunpack.c.l.b16 %v1105_v54 }
 0x510   : > { %v1126_v10 = vpack.c.b16 %v1124_v35, %v1124_v35  ;;  %1674 = vmatmul.msk.bf16.gmra.mxu2 %vm637_vm12, %v1162_v7 }
 0x511   : > { %v1021_v12 = vpop.f32.mrf.mxu2 }
 0x512   : > { %1672 = vmatmul.msk.bf16.gmra.mxu1 %vm637_vm12, %v1126_v10 }
 0x513   : > { %v981_v8 = vpop.f32.mrf.mxu1  ;;  %v1099_v56 = vpop.f32.mrf.mxu0 }
 0x514   : > { %v1114_v13 = vpack.c.bf16 %v1099_v56, %v1099_v56  ;;  %v1059_v15 = vpop.f32.mrf.mxu3 }
 0x515   : > { %v1111_v33 = vpack.c.bf16 %v1059_v15, %v1059_v15 }
 0x516   : > { %v1230_v43 = vunpack.c.l.b16 %v1114_v13 }
 0x517   : > { %v1195_v57 = vunpack.c.l.b16 %v1111_v33 }
 0x518   : > { %v1232_v11 = vpack.c.b16 %v1230_v43, %v1230_v43 }
 0x519   : > { %v1197_v17 = vpack.c.b16 %v1195_v57, %v1195_v57 }
 0x51a   : > { %1678 = vmatmul.msk.bf16.gmra.mxu0 %vm637_vm12, %v1232_v11 }
 0x51b   : > { %v1101_v19 = vpop.f32.mrf.mxu0  ;;  %1676 = vmatmul.msk.bf16.gmra.mxu3 %vm637_vm12, %v1197_v17 }
 0x51c   : > { %v1061_v52 = vpop.f32.mrf.mxu3 }
 0x51d   : > { %v1729_v52 = vld [vmem:[%s2327_s9 + $0x8] sm:$0xff] }
 0x51e   : > { %1405 = vmatpush.bf16.msrb.mxu1 %v1729_v52 }
 0x563   : > { %v1146_v21 = vpop.f32.mrf.mxu1  ;;  %v1181_v22 = vpop.f32.mrf.mxu2 }
 0x564   : > { %v1260_v16 = vsel %vm450_vm0, %v1146_v21, 0.0  ;;  %v1261_v18 = vsel %vm450_vm0, %v1181_v22, 0.0 }
 0x565   : > { %v1262_v23 = vadd.f32 %v1261_v18, %v1260_v16  ;;  %v1728_v16 = vld [vmem:[%s2327_s9] sm:$0xff] }
 0x566   : > { %1406 = vmatpush.bf16.msrb.mxu1 %v1728_v16 }
 0x56b   : > { %v1148_v20 = vpop.f32.mrf.mxu1  ;;  %v1183_v60 = vpop.f32.mrf.mxu2 }
 0x56c   : > { %v1216_v25 = vpop.f32.mrf.mxu3  ;;  %v1267_v36 = vsel %vm450_vm0, %v1148_v20, 0.0  ;;  %v1268_v37 = vsel %vm450_vm0, %v1183_v60, 0.0 }
 0x56d   : > { %v1263_v5 = vsel %vm450_vm0, %v1216_v25, 0.0  ;;  %v1269_v41 = vadd.f32 %v1268_v37, %v1267_v36 }
 0x56e   : > { %v1264_v24 = vadd.f32 %v1263_v5, %v1262_v23 }
 0x574   : > { %v1218_v29 = vpop.f32.mrf.mxu3 }
 0x575   : > { %v1270_v40 = vsel %vm450_vm0, %v1218_v29, 0.0 }
 0x576   : > { %v1271_v45 = vadd.f32 %v1270_v40, %v1269_v41 }
 0x587   : > { %v1251_v26 = vpop.f32.mrf.mxu0 }
 0x588   : > { %v1265_v27 = vsel %vm450_vm0, %v1251_v26, 0.0 }
 0x589   : > { %v1266_v31 = vadd.f32 %v1265_v27, %v1264_v24 }
 0x58b   : > { %v1281_v39 = vadd.f32 %v1958_v2, %v1266_v31 }
 0x58d   : > { %v2231_v42 = vadd.f32 %v1778_v34, %v1281_v39 }
 0x58f   : > { %v1151_v47 = vpop.f32.mrf.mxu1  ;;  %v1253_v30 = vpop.f32.mrf.mxu0  ;;  %v1293_v48 = vsel %vm450_vm0, %v2231_v42, 0.0 }
 0x590   : > { %v1272_v49 = vsel %vm450_vm0, %v1253_v30, 0.0  ;;  %1294 = vadd.xlane.f32.xlu2 %v1293_v48  ;;  %v1274_v53 = vsel %vm457_vm1, %v1151_v47, 0.0  ;;  %v1779_v47 = vld [vmem:[%s2325_s7] ss:$0 sm:$0xff] }
 0x591   : > { %v1273_v50 = vadd.f32 %v1272_v49, %v1271_v45 }
 0x593   : > { %v1282_v38 = vadd.f32 %v1966_v6, %v1273_v50  ;;  %v1186_v51 = vpop.f32.mrf.mxu2 }
 0x594   : > { %v1275_v44 = vsel %vm457_vm1, %v1186_v51, 0.0 }
 0x595   : > { %v2237_v55 = vadd.f32 %v1778_v34, %v1282_v38  ;;  %v1276_v63 = vadd.f32 %v1275_v44, %v1274_v53  ;;  %v1780_v38 = vld [vmem:[%s2326_s8] ss:$0 sm:$0xff] }
 0x597   : > { %v1153_v2 = vpop.f32.mrf.mxu1  ;;  %v1256_v32 = vpop.f32.mrf.mxu0  ;;  %v1296_v58 = vsel %vm450_vm0, %v2237_v55, 0.0 }
 0x598   : > { %1297 = vadd.xlane.f32.xlu0 %v1296_v58  ;;  %v1279_v9 = vsel %vm457_vm1, %v1256_v32, 0.0 }
 0x59b   : > { %v1188_v62 = vpop.f32.mrf.mxu2 }
 0x59e   : > { %v1221_v0 = vpop.f32.mrf.mxu3 }
 0x59f   : > { %v1277_v1 = vsel %vm457_vm1, %v1221_v0, 0.0  ;;  %v1258_v4 = vpop.f32.mrf.mxu0 }
 0x5a0   : > { %v1278_v6 = vadd.f32 %v1277_v1, %v1276_v63 }
 0x5a2   : > { %v1280_v28 = vadd.f32 %v1279_v9, %v1278_v6 }
 0x5a4   : > { %v1283_v46 = vadd.f32 %v1280_v28, %v1960_v3 }
 0x5a6   : > { %v1223_v59 = vpop.f32.mrf.mxu3  ;;  %v2246_v61 = vadd.f32 %v1778_v34, %v1283_v46 }
 0x5a8   : > { %v1299_v54 = vsel %vm457_vm1, %v2246_v61, 0.0 }
 0x5a9   : > { %1300 = vadd.xlane.f32.xlu0 %v1299_v54  ;;  %v1737_v54 = vld [vmem:[%s2329_s11 + $0x38] sm:$0xff] }
 0x5aa   : > { %1550 = vmatpush.bf16.msrb.mxu2 %v1737_v54 }
 0x603   : > { %v1295_v7 = vpop.xlane.xlu2 %1294 }
 0x604   : > { %v1302_v35 = vmul.f32 %v1295_v7, %v1970_v14  ;;  %v1736_v7 = vld [vmem:[%s2329_s11 + $0x30] sm:$0xff] }
 0x605   : > { %1551 = vmatpush.bf16.msrb.mxu2 %v1736_v7 }
 0x606   : > { %v1305_v10 = vsub.f32 %v2231_v42, %v1302_v35  ;;  %v1735_v35 = vld [vmem:[%s2329_s11 + $0x28] sm:$0xff] }
 0x608   : > { %v1308_v12 = vmul.f32 %v1305_v10, %v1305_v10 }
 0x609   : > { %1552 = vmatpush.bf16.msrb.mxu2 %v1735_v35  ;;  %v1782_v35 = vld [vmem:[%s2330_s12] ss:$0 sm:$0xff] }
 0x60a   : > { %v1311_v8 = vsel %vm450_vm0, %v1308_v12, 0.0  ;;  %v1781_v12 = vld [vmem:[%s2328_s10] ss:$0 sm:$0xff] }
 0x60b   : > { %v1298_v56 = vpop.xlane.xlu0 %1297  ;;  %1312 = vadd.xlane.f32.xlu0 %v1311_v8  ;;  %v1733_v8 = vld [vmem:[%s2329_s11 + $0x18] sm:$0xff] }
 0x60c   : > { %v1303_v13 = vmul.f32 %v1298_v56, %v1970_v14 }
 0x60e   : > { %v1306_v3 = vsub.f32 %v2237_v55, %v1303_v13 }
 0x610   : > { %v1309_v15 = vmul.f32 %v1306_v3, %v1306_v3 }
 0x612   : > { %v1314_v33 = vsel %vm450_vm0, %v1309_v15, 0.0 }
 0x613   : > { %1315 = vadd.xlane.f32.xlu1 %v1314_v33 }
 0x61c   : > { %v1301_v43 = vpop.xlane.xlu0 %1300 }
 0x61d   : > { %v1304_v57 = vmul.f32 %v1301_v43, %v1970_v14  ;;  %v1731_v43 = vld [vmem:[%s2329_s11 + $0x8] sm:$0xff] }
 0x61f   : > { %v1307_v11 = vsub.f32 %v2246_v61, %v1304_v57 }
 0x621   : > { %v1310_v17 = vmul.f32 %v1307_v11, %v1307_v11 }
 0x623   : > { %v1317_v19 = vsel %vm457_vm1, %v1310_v17, 0.0  ;;  %v1730_v17 = vld [vmem:[%s2329_s11] sm:$0xff] }
 0x624   : > { %1318 = vadd.xlane.f32.xlu0 %v1317_v19 }
 0x67e   : > { %v1313_v21 = vpop.xlane.xlu0 %1312 }
 0x67f   : > { %v1320_v22 = vmul.f32 %v1313_v21, %v1970_v14 }
 0x681   : > { %v1323_v25 = vadd.f32 1e-05, %v1320_v22 }
 0x683   : > { %1839 = vrsqrt.f32 %v1323_v25  ;;  %vm1332_vm4 = vweird.f32 %v1323_v25 }
 0x686   : > { %v1316_v18 = vpop.xlane.xlu1 %1315 }
 0x687   : > { %v1321_v5 = vmul.f32 %v1316_v18, %v1970_v14 }
 0x689   : > { %v1840_v23 = vpop.eup %1839  ;;  %v1324_v20 = vadd.f32 1e-05, %v1321_v5 }
 0x68a   : > { %v1327_v60 = vmul.f32 %v1840_v23, %v1323_v25  ;;  %vm1333_vm3 = vweird.f32 %v1840_v23 }
 0x68b   : > { %1841 = vrsqrt.f32 %v1324_v20  ;;  %vm1334_vm5 = vmor %vm1332_vm4, %vm1333_vm3  ;;  %vm1342_vm7 = vweird.f32 %v1324_v20 }
 0x68c   : > { %v1328_v24 = vmul.f32 %v1840_v23, %v1327_v60 }
 0x68e   : > { %v1329_v26 = vmul.f32 0.5, %v1328_v24 }
 0x690   : > { %v1330_v27 = vsub.f32 1.5, %v1329_v26 }
 0x691   : > { %v1842_v29 = vpop.eup %1841 }
 0x692   : > { %v1331_v31 = vmul.f32 %v1840_v23, %v1330_v27  ;;  %v1337_v34 = vmul.f32 %v1842_v29, %v1324_v20  ;;  %vm1343_vm6 = vweird.f32 %v1842_v29 }
 0x693   : > { %vm1344_vm8 = vmor %vm1342_vm7, %vm1343_vm6 }
 0x694   : > { %v1338_v36 = vmul.f32 %v1842_v29, %v1337_v34  ;;  %v1335_v37 = vsel %vm1334_vm5, %v1840_v23, %v1331_v31 }
 0x695   : > { %v1356_v30 = vmul.f32 %v1335_v37, %v1305_v10  ;;  %v1734_v10 = vld [vmem:[%s2329_s11 + $0x20] sm:$0xff] }
 0x696   : > { %v1339_v39 = vmul.f32 0.5, %v1338_v36  ;;  %1553 = vmatpush.bf16.msrb.mxu2 %v1734_v10 }
 0x697   : > { %v1319_v40 = vpop.xlane.xlu0 %1318  ;;  %v1362_v51 = vmul.f32 %v1779_v47, %v1356_v30 }
 0x698   : > { %v1340_v41 = vsub.f32 1.5, %v1339_v39  ;;  %v1322_v45 = vmul.f32 %v1319_v40, %v1970_v14 }
 0x699   : > { %v1368_v58 = vadd.f32 %v1780_v38, %v1362_v51 }
 0x69a   : > { %v1341_v48 = vmul.f32 %v1842_v29, %v1340_v41  ;;  %v1325_v49 = vadd.f32 1e-05, %v1322_v45  ;;  %1554 = vmatpush.bf16.msrb.mxu2 %v1733_v8 }
 0x69c   : > { %v1345_v50 = vsel %vm1344_vm8, %v1842_v29, %v1341_v48  ;;  %1843 = vrsqrt.f32 %v1325_v49  ;;  %vm1352_vm10 = vweird.f32 %v1325_v49 }
 0x69d   : > { %v1357_v2 = vmul.f32 %v1345_v50, %v1306_v3  ;;  %v1732_v3 = vld [vmem:[%s2329_s11 + $0x10] sm:$0xff] }
 0x69e   : > { %1555 = vmatpush.bf16.msrb.mxu2 %v1732_v3 }
 0x69f   : > { %v1363_v32 = vmul.f32 %v1779_v47, %v1357_v2 }
 0x6a1   : > { %v1369_v14 = vadd.f32 %v1780_v38, %v1363_v32 }
 0x6a2   : > { %v1844_v44 = vpop.eup %1843  ;;  %1556 = vmatpush.bf16.msrb.mxu2 %v1731_v43 }
 0x6a3   : > { %v1347_v62 = vmul.f32 %v1844_v44, %v1325_v49  ;;  %v1371_v53 = vpack.c.bf16 %v1369_v14, %v1368_v58  ;;  %vm1353_vm9 = vweird.f32 %v1844_v44 }
 0x6a4   : > { %vm1354_vm11 = vmor %vm1352_vm10, %vm1353_vm9  ;;  %vm1574_vm9 = vcmask 257024   ;;  %vm1578_vm10 = vsmask.f32 256 }
 0x6a5   : > { %v1348_v63 = vmul.f32 %v1844_v44, %v1347_v62  ;;  %1687 = vmatmul.msk.bf16.vlgmr.msrb.gmra.mxu1 %vm450_vm0, %v1371_v53 }
 0x6a6   : > { %1557 = vmatpush.bf16.msrb.mxu2 %v1730_v17 }
 0x6a7   : > { %v1349_v0 = vmul.f32 0.5, %v1348_v63 }
 0x6a9   : > { %v1350_v1 = vsub.f32 1.5, %v1349_v0 }
 0x6ab   : > { %v1351_v4 = vmul.f32 %v1844_v44, %v1350_v1 }
 0x6ad   : > { %v1355_v6 = vsel %vm1354_vm11, %v1844_v44, %v1351_v4  ;;  %vm1579_vm11 = vmand %vm457_vm1, %vm1578_vm10 }
 0x6ae   : > { %v1358_v9 = vmul.f32 %v1355_v6, %v1307_v11 }
 0x6b0   : > { %v1364_v28 = vmul.f32 %v1779_v47, %v1358_v9 }
 0x6b2   : > { %v1370_v46 = vadd.f32 %v1780_v38, %v1364_v28 }
 0x6b4   : > { %v1372_v59 = vpack.c.bf16 %v1370_v46, %v1370_v46 }
 0x6b6   : > { %1688 = vmatmul.msk.bf16.gmra.mxu1 %vm450_vm0, %v1372_v59 }
 0x722   : > { %v1408_v56 = vpop.f32.mrf.mxu1 }
 0x723   : > { %v1409_v13 = vadd.f32 %v1781_v12, %v1408_v56 }
 0x725   : > { %v1689_v15 = vmul.f32 -1.702, %v1409_v13 }
 0x727   : > { %v1423_v33 = vmul.f32 1.442695, %v1689_v15 }
 0x729   : > { %1845 = vpow2.f32 %v1423_v33 }
 0x72a   : > { %v1410_v57 = vpop.f32.mrf.mxu1 }
 0x72b   : > { %v1411_v11 = vadd.f32 %v1781_v12, %v1410_v57 }
 0x72d   : > { %v1690_v19 = vmul.f32 -1.702, %v1411_v11 }
 0x72f   : > { %v1846_v52 = vpop.eup %1845  ;;  %v1425_v21 = vmul.f32 1.442695, %v1690_v19 }
 0x730   : > { %v1429_v22 = vadd.f32 1.0, %v1846_v52 }
 0x731   : > { %1847 = vpow2.f32 %v1425_v21 }
 0x732   : > { %1849 = vrcp.f32 %v1429_v22  ;;  %v1443_v39 = vand.u32 2147483648, %v1429_v22  ;;  %vm1437_vm12 = vweird.f32 %v1429_v22  ;;  %v1441_v41 = vand.u32 2147483647, %v1429_v22 }
 0x733   : > { %v1413_v25 = vpop.f32.mrf.mxu1 }
 0x734   : > { %v1414_v16 = vadd.f32 %v1781_v12, %v1413_v25  ;;  %v1444_v50 = vor.u32 1.1754944e-38, %v1443_v39  ;;  %vm1442_vm15 = vcmp.eq.f32.partialorder %v1441_v41, 8.507059e+37 }
 0x736   : > { %v1691_v18 = vmul.f32 -1.702, %v1414_v16 }
 0x737   : > { %v1848_v5 = vpop.eup %1847 }
 0x738   : > { %v1850_v23 = vpop.eup %1849  ;;  %v1430_v20 = vadd.f32 1.0, %v1848_v5  ;;  %v1427_v60 = vmul.f32 1.442695, %v1691_v18 }
 0x739   : > { %v1433_v24 = vmul.f32 %v1850_v23, %v1429_v22  ;;  %vm1438_vm0 = vweird.f32 %v1850_v23 }
 0x73a   : > { %1851 = vrcp.f32 %v1430_v20  ;;  %vm1439_vm13 = vmor %vm1437_vm12, %vm1438_vm0  ;;  %v1458_v47 = vand.u32 2147483648, %v1430_v20  ;;  %v1456_v49 = vand.u32 2147483647, %v1430_v20  ;;  %vm1452_vm2 = vweird.f32 %v1430_v20 }
 0x73b   : > { %v1434_v26 = vsub.f32 1.0, %v1433_v24  ;;  %1853 = vpow2.f32 %v1427_v60  ;;  %v1415_v27 = vpop.f32.mrf.mxu1 }
 0x73c   : > { %v1459_v2 = vor.u32 1.1754944e-38, %v1458_v47  ;;  %vm1457_vm4 = vcmp.eq.f32.partialorder %v1456_v49, 8.507059e+37 }
 0x73d   : > { %v1435_v29 = vmul.f32 %v1850_v23, %v1434_v26 }
 0x73f   : > { %v1436_v36 = vadd.f32 %v1850_v23, %v1435_v29 }
 0x740   : > { %v1852_v31 = vpop.eup %1851 }
 0x741   : > { %v1854_v34 = vpop.eup %1853  ;;  %v1448_v37 = vmul.f32 %v1852_v31, %v1430_v20  ;;  %v1440_v30 = vsel %vm1439_vm13, %v1850_v23, %v1436_v36  ;;  %vm1453_vm14 = vweird.f32 %v1852_v31 }
 0x742   : > { %v1431_v40 = vadd.f32 1.0, %v1854_v34  ;;  %v1445_v51 = vsel %vm1442_vm15, %v1444_v50, %v1440_v30  ;;  %vm1454_vm3 = vmor %vm1452_vm2, %vm1453_vm14 }
 0x743   : > { %v1449_v45 = vsub.f32 1.0, %v1448_v37  ;;  %v1477_v44 = vmul.f32 %v1445_v51, %v1409_v13 }
 0x744   : > { %1855 = vrcp.f32 %v1431_v40  ;;  %v1473_v4 = vand.u32 2147483648, %v1431_v40  ;;  %vm1467_vm6 = vweird.f32 %v1431_v40  ;;  %v1471_v9 = vand.u32 2147483647, %v1431_v40 }
 0x745   : > { %v1450_v48 = vmul.f32 %v1852_v31, %v1449_v45 }
 0x746   : > { %v1474_v46 = vor.u32 1.1754944e-38, %v1473_v4  ;;  %vm1472_vm8 = vcmp.eq.f32.partialorder %v1471_v9, 8.507059e+37 }
 0x747   : > { %v1451_v38 = vadd.f32 %v1852_v31, %v1450_v48 }
 0x749   : > { %v1455_v32 = vsel %vm1454_vm3, %v1852_v31, %v1451_v38 }
 0x74a   : > { %v1856_v58 = vpop.eup %1855  ;;  %v1460_v14 = vsel %vm1457_vm4, %v1459_v2, %v1455_v32 }
 0x74b   : > { %v1478_v62 = vmul.f32 %v1460_v14, %v1411_v11  ;;  %v1463_v53 = vmul.f32 %v1856_v58, %v1431_v40  ;;  %vm1468_vm5 = vweird.f32 %v1856_v58 }
 0x74c   : > { %vm1469_vm7 = vmor %vm1467_vm6, %vm1468_vm5 }
 0x74d   : > { %v1480_v63 = vpack.c.bf16 %v1478_v62, %v1477_v44  ;;  %v1464_v0 = vsub.f32 1.0, %v1463_v53 }
 0x74f   : > { %1558 = vmatmul.bf16.vlgmr.msrb.gmra.mxu2 %v1480_v63  ;;  %v1465_v1 = vmul.f32 %v1856_v58, %v1464_v0 }
 0x751   : > { %v1466_v6 = vadd.f32 %v1856_v58, %v1465_v1 }
 0x753   : > { %v1470_v28 = vsel %vm1469_vm7, %v1856_v58, %v1466_v6 }
 0x754   : > { %v1475_v59 = vsel %vm1472_vm8, %v1474_v46, %v1470_v28 }
 0x755   : > { %v1479_v54 = vmul.f32 %v1475_v59, %v1414_v16 }
 0x757   : > { %v1481_v7 = vpack.c.bf16 %v1479_v54, %v1479_v54 }
 0x75f   : > { %1563 = vmatmul.bf16.gmra.mxu2 %v1481_v7 }
 0x7d2   : > { %v1559_v10 = vpop.f32.mrf.mxu2 }
 0x7d3   : > { %v1560_v12 = vadd.f32 %v1782_v35, %v1559_v10 }
 0x7d5   : > { %v1568_v8 = vadd.f32 %v1560_v12, %v2231_v42  ;;  %v1580_v42 = vld [vmem:[%s440_s30 + $0x8] sm:$0x1] }
 0x7d7   : > { %v1571_v56 = vpack.c.bf16 %v1568_v8, %v1568_v8 }
 0x7d9   : > { %1575 = vst.msk [vmem:[%s440_s30] sm:$0xf] %vm1574_vm9, %v1571_v56 }
 0x7da   : > { %v1561_v13 = vpop.f32.mrf.mxu2 }
 0x7db   : > { %v1562_v3 = vadd.f32 %v1782_v35, %v1561_v13 }
 0x7dd   : > { %v1569_v15 = vadd.f32 %v1562_v3, %v2237_v55 }
 0x7df   : > { %v1572_v33 = vpack.c.bf16 %v1569_v15, %v1569_v15 }
 0x7e1   : > { %1576 = vst.msk [vmem:[%s440_s30 + $0x4] sm:$0xf] %vm1574_vm9, %v1572_v33 }
 0x7e2   : > { %v1564_v43 = vpop.f32.mrf.mxu2 }
 0x7e3   : > { %v1565_v57 = vadd.f32 %v1782_v35, %v1564_v43 }
 0x7e5   : > { %v1570_v11 = vadd.f32 %v1565_v57, %v2246_v61 }
 0x7e7   : > { %v1573_v17 = vpack.c.bf16 %v1570_v11, %v1570_v11 }
 0x7e9   : > { %v1581_v19 = vsel %vm1579_vm11, %v1573_v17, %v1580_v42 }
 0x7ea   : > { %1582 = vst [vmem:[%s440_s30 + $0x8] sm:$0x1] %v1581_v19  ;;  %v1566_v52 = vpop.f32.mrf.mxu2 }
 0x7eb PF: > { %s23_s25 = sadd.s32 1, %s1863_s25  }
 0x7ec   : > { %p20_p4 = scmp.ge.s32.totalorder %s23_s25, 4  }
 0x7ee   :  { %22 = sbr.rel (!%p20_p4) target bundleno = 1 (0x1), region = 102 }

</bundles_post_ra>
